<compile_context>
chip_gen: v7x
topology: tpu7x:2x2x1
jax: 0.10.0
libtpu: 0.0.40
codegen_flags: <defaults>
</compile_context>

<pallas_src>
import functools
import math

import jax
import jax.numpy as jnp
from jax.experimental import pallas as pl
from jax.experimental.pallas import tpu as pltpu

EPS = 1e-5


# ---------------------------------------------------------------------------
# Fused dense-block kernel: one grid step == one image, all layers unrolled.
# All refs use the transposed layout (channels on sublanes, H*W on lanes).
# ---------------------------------------------------------------------------
def _dense_block_kernel(x_ref, masks_ref, s1_ref, b1_ref, w1_ref,
                        s2_ref, b2_ref, w2_ref, bias_ref, o_ref,
                        *, n_layers, c_in, growth, shifts):
    """
    x_ref     : (c_in, HW)            input channels of this image
    masks_ref : (9, 1, HW)            boundary masks for the 9 conv taps
    s1/b1_ref : (L, C_final, 1)       folded BN1 scale/shift (zero-padded)
    w1_ref    : (L, c_mid, C_final)   1x1 conv weights (zero-padded columns)
    s2/b2_ref : (L, c_mid, 1)         folded BN2 scale/shift
    w2_ref    : (L, growth, 9*c_mid)  3x3 conv weights, im2col layout
    bias_ref  : (L, growth, 1)        3x3 conv bias
    o_ref     : (C_final, HW)         feature buffer == output block (VMEM)
    """
    # ---- init the VMEM-resident feature buffer --------------------------
    o_ref[...] = jnp.zeros(o_ref.shape, o_ref.dtype)    # future rows := 0
    o_ref[:c_in, :] = x_ref[...]                        # input channels

    # ---- hoist the (tiny) tap masks once; reused by every layer ---------
    tap_masks = [masks_ref[t] for t in range(9)]        # each (1, HW)

    # ---- layers (unrolled; features never leave VMEM) -------------------
    for l in range(n_layers):
        feat = o_ref[...]                               # (C_final, HW)
        # BN1 + ReLU (scale/shift zero-padded beyond this layer's channels)
        h = jnp.maximum(feat * s1_ref[l] + b1_ref[l], 0.0)
        # 1x1 conv:  (c_mid, C_final) @ (C_final, HW) -> (c_mid, HW)
        z = jnp.dot(w1_ref[l], h, preferred_element_type=jnp.float32)
        # BN2 + ReLU
        a = jnp.maximum(z * s2_ref[l] + b2_ref[l], 0.0)
        # 3x3 conv (+bias): im2col via lane rolls + masks, one MXU matmul
        cols = []
        for t in range(9):
            col = a if shifts[t] == 0 else pltpu.roll(a, shifts[t], axis=1)
            cols.append(col * tap_masks[t])
        slab = jnp.concatenate(cols, axis=0)            # (9*c_mid, HW)
        y = jnp.dot(w2_ref[l], slab,
                    preferred_element_type=jnp.float32) + bias_ref[l]
        # dense concatenation == in-place store of the new channel rows
        off = c_in + l * growth
        o_ref[off:off + growth, :] = y


def _make_tap_tables(H, W):
    """Boundary masks (9, 1, H*W) and lane-roll shifts for the 3x3 taps."""
    hw = H * W
    h_idx = jnp.arange(H, dtype=jnp.int32).reshape(H, 1)
    w_idx = jnp.arange(W, dtype=jnp.int32).reshape(1, W)
    masks, shifts = [], []
    for ky in range(3):
        for kx in range(3):
            oy, ox = ky - 1, kx - 1
            valid = ((h_idx + oy >= 0) & (h_idx + oy < H) &
                     (w_idx + ox >= 0) & (w_idx + ox < W))
            masks.append(valid.astype(jnp.float32).reshape(1, hw))
            # want col[:, m] = a[:, m + (oy*W + ox)]  =>  np.roll-style shift
            shifts.append((-(oy * W + ox)) % hw)
    return jnp.stack(masks), tuple(shifts)


# ---------------------------------------------------------------------------
# Wrapper: NCHW in, NCHW out (only free reshapes outside the kernel)
# ---------------------------------------------------------------------------
def dense_block_forward(x_nchw, kp, *, c_in, growth, n_layers, H, W):
    N = x_nchw.shape[0]
    hw = H * W
    c_final = c_in + n_layers * growth
    x_t = x_nchw.reshape(N, c_in, hw).astype(jnp.float32)   # free reshape
    masks, shifts = _make_tap_tables(H, W)

    kernel = functools.partial(_dense_block_kernel, n_layers=n_layers,
                               c_in=c_in, growth=growth, shifts=shifts)

    def full(a):   # small parameter array, same full block every grid step
        return pl.BlockSpec(a.shape, lambda n: (0,) * a.ndim)

    out = pl.pallas_call(
        kernel,
        out_shape=jax.ShapeDtypeStruct((N, c_final, hw), jnp.float32),
        grid=(N,),
        in_specs=[
            pl.BlockSpec((None, c_in, hw), lambda n: (n, 0, 0)),
            full(masks), full(kp["s1"]), full(kp["b1"]), full(kp["w1"]),
            full(kp["s2"]), full(kp["b2"]), full(kp["w2"]), full(kp["bias"]),
        ],
        out_specs=pl.BlockSpec((None, c_final, hw), lambda n: (n, 0, 0)),
        compiler_params=pltpu.CompilerParams(
            dimension_semantics=("parallel",),
            vmem_limit_bytes=32 * 1024 * 1024),
    )(x_t, masks, kp["s1"], kp["b1"], kp["w1"],
      kp["s2"], kp["b2"], kp["w2"], kp["bias"])
    return out.reshape(N, c_final, H, W)                    # NCHW


# ---------------------------------------------------------------------------
# Parameter construction (deterministic; matches PyTorch module shapes)
# ---------------------------------------------------------------------------
def _fold_bn(gamma, beta, mean, var):
    scale = gamma / jnp.sqrt(var + EPS)
    shift = beta - mean * scale
    return scale, shift


def make_layer_raw_params(key, c_in_l, growth, mult):
    c_mid = mult * growth
    ks = jax.random.split(key, 11)
    # BatchNorm2d(c_in_l)
    g1 = 1.0 + 0.1 * jax.random.normal(ks[0], (c_in_l,), jnp.float32)
    be1 = 0.1 * jax.random.normal(ks[1], (c_in_l,), jnp.float32)
    m1 = 0.1 * jax.random.normal(ks[2], (c_in_l,), jnp.float32)
    v1 = jax.random.uniform(ks[3], (c_in_l,), jnp.float32, 0.5, 1.5)
    # Conv2d(c_in_l, c_mid, 1, bias=False)  -> weight (c_mid, c_in_l)
    w1_oi = jax.random.normal(ks[4], (c_mid, c_in_l), jnp.float32) / math.sqrt(c_in_l)
    # BatchNorm2d(c_mid)
    g2 = 1.0 + 0.1 * jax.random.normal(ks[5], (c_mid,), jnp.float32)
    be2 = 0.1 * jax.random.normal(ks[6], (c_mid,), jnp.float32)
    m2 = 0.1 * jax.random.normal(ks[7], (c_mid,), jnp.float32)
    v2 = jax.random.uniform(ks[8], (c_mid,), jnp.float32, 0.5, 1.5)
    # Conv2d(c_mid, growth, 3, padding=1) -> weight (growth, c_mid, 3, 3), bias
    w2_oihw = jax.random.normal(ks[9], (growth, c_mid, 3, 3), jnp.float32) \
        / math.sqrt(9 * c_mid)
    b2 = 0.01 * jax.random.normal(ks[10], (growth,), jnp.float32)
    return dict(g1=g1, be1=be1, m1=m1, v1=v1, w1_oi=w1_oi,
                g2=g2, be2=be2, m2=m2, v2=v2, w2_oihw=w2_oihw, b2=b2)


def make_dense_block_raw_params(key, n_layers, c_in, growth, mult):
    raws = []
    for l in range(n_layers):
        key, sub = jax.random.split(key)
        raws.append(make_layer_raw_params(sub, c_in + l * growth, growth, mult))
    return raws


def build_kernel_params(raws, c_in, growth, mult, n_layers):
    """Fold BN, transpose/zero-pad weights into the kernel's stacked layout."""
    c_final = c_in + n_layers * growth
    c_mid = mult * growth
    s1s, b1s, w1s, s2s, b2s, w2s, biases = [], [], [], [], [], [], []
    for l, r in enumerate(raws):
        c_in_l = c_in + l * growth
        s1, sh1 = _fold_bn(r["g1"], r["be1"], r["m1"], r["v1"])
        s2, sh2 = _fold_bn(r["g2"], r["be2"], r["m2"], r["v2"])
        # zero-pad layer-l params to the final channel count => each layer
        # does one aligned, full-width read of the feature buffer.
        s1s.append(jnp.zeros((c_final,), jnp.float32).at[:c_in_l].set(s1))
        b1s.append(jnp.zeros((c_final,), jnp.float32).at[:c_in_l].set(sh1))
        w1s.append(jnp.zeros((c_mid, c_final), jnp.float32)
                   .at[:, :c_in_l].set(r["w1_oi"]))
        s2s.append(s2)
        b2s.append(sh2)
        # (o, i, ky, kx) -> (o, ky, kx, i) -> (o, 9*i)  (matches im2col slab)
        w2s.append(jnp.transpose(r["w2_oihw"], (0, 2, 3, 1))
                   .reshape(growth, 9 * c_mid))
        biases.append(r["b2"])
    return {
        "s1": jnp.stack(s1s)[..., None],        # (L, C_final, 1)
        "b1": jnp.stack(b1s)[..., None],        # (L, C_final, 1)
        "w1": jnp.stack(w1s),                   # (L, c_mid, C_final)
        "s2": jnp.stack(s2s)[..., None],        # (L, c_mid, 1)
        "b2": jnp.stack(b2s)[..., None],        # (L, c_mid, 1)
        "w2": jnp.stack(w2s),                   # (L, growth, 9*c_mid)
        "bias": jnp.stack(biases)[..., None],   # (L, growth, 1)
    }


# ---------------------------------------------------------------------------
# Pure-JAX reference (NCHW, mirrors the PyTorch graph in eval mode)
# ---------------------------------------------------------------------------
def _ref_bn(x_nchw, g, b, m, v):
    g = g.reshape(1, -1, 1, 1); b = b.reshape(1, -1, 1, 1)
    m = m.reshape(1, -1, 1, 1); v = v.reshape(1, -1, 1, 1)
    return (x_nchw - m) / jnp.sqrt(v + EPS) * g + b


def ref_dense_block(x_nchw, raws):
    feat = x_nchw.astype(jnp.float32)
    for r in raws:
        h = jnp.maximum(_ref_bn(feat, r["g1"], r["be1"], r["m1"], r["v1"]), 0.0)
        z = jnp.einsum("nchw,oc->nohw", h, r["w1_oi"],
                       precision=jax.lax.Precision.HIGHEST)
        a = jnp.maximum(_ref_bn(z, r["g2"], r["be2"], r["m2"], r["v2"]), 0.0)
        y = jax.lax.conv_general_dilated(
            a, r["w2_oihw"], window_strides=(1, 1), padding="SAME",
            dimension_numbers=("NCHW", "OIHW", "NCHW"),
            precision=jax.lax.Precision.HIGHEST)
        y = y + r["b2"].reshape(1, -1, 1, 1)
        feat = jnp.concatenate([feat, y], axis=1)
    return feat


# ---------------------------------------------------------------------------
if __name__ == "__main__":
    # _DenseBlock(num_layers=3, num_input_channels=4, growth_rate=4,
    #             multiply_factor=2, dropout_rate=0.0)
    num_layers, c_in, growth, mult = 3, 4, 4, 2
    N, H, W = 2, 16, 16

    key = jax.random.PRNGKey(0)
    key_x, key_p = jax.random.split(key)
    x = jax.random.normal(key_x, (N, c_in, H, W), jnp.float32)   # NCHW input

    raws = make_dense_block_raw_params(key_p, num_layers, c_in, growth, mult)
    kparams = build_kernel_params(raws, c_in, growth, mult, num_layers)

    out = dense_block_forward(x, kparams, c_in=c_in, growth=growth,
                              n_layers=num_layers, H=H, W=W)
    out = jax.block_until_ready(out)

    expected_channels = c_in + num_layers * growth
    assert out.shape == (N, expected_channels, H, W), out.shape

    ref = ref_dense_block(x, raws)
    assert jnp.allclose(out, ref, rtol=2e-3, atol=2e-3), (
        float(jnp.max(jnp.abs(out - ref))))

    print("KERNEL_OK")
</pallas_src>

<mosaic_0001>
module attributes {stable_mosaic.version = 11 : i64} {
  func.func @_dense_block_kernel(%arg0: i32, %arg1: memref<1x4x256xf32, #tpu.memory_space<vmem>>, %arg2: memref<9x1x256xf32, #tpu.memory_space<vmem>>, %arg3: memref<3x16x1xf32, #tpu.memory_space<vmem>>, %arg4: memref<3x16x1xf32, #tpu.memory_space<vmem>>, %arg5: memref<3x8x16xf32, #tpu.memory_space<vmem>>, %arg6: memref<3x8x1xf32, #tpu.memory_space<vmem>>, %arg7: memref<3x8x1xf32, #tpu.memory_space<vmem>>, %arg8: memref<3x4x72xf32, #tpu.memory_space<vmem>>, %arg9: memref<3x4x1xf32, #tpu.memory_space<vmem>>, %arg10: memref<1x16x256xf32, #tpu.memory_space<vmem>>) attributes {dimension_semantics = [#tpu.dimension_semantics<parallel>], iteration_bounds = array<i64: 2>, scalar_prefetch = 0 : i64, scratch_operands = 0 : i64, tpu.core_type = #tpu.core_type<tc>, window_params = [{transform_indices = @transform_0, window_bounds = array<i64: 1, 4, 256>}, {pipeline_mode = #tpu.pipeline_mode<synchronous>, transform_indices = @transform_1, window_bounds = array<i64: 9, 1, 256>}, {pipeline_mode = #tpu.pipeline_mode<synchronous>, transform_indices = @transform_2, window_bounds = array<i64: 3, 16, 1>}, {pipeline_mode = #tpu.pipeline_mode<synchronous>, transform_indices = @transform_3, window_bounds = array<i64: 3, 16, 1>}, {pipeline_mode = #tpu.pipeline_mode<synchronous>, transform_indices = @transform_4, window_bounds = array<i64: 3, 8, 16>}, {pipeline_mode = #tpu.pipeline_mode<synchronous>, transform_indices = @transform_5, window_bounds = array<i64: 3, 8, 1>}, {pipeline_mode = #tpu.pipeline_mode<synchronous>, transform_indices = @transform_6, window_bounds = array<i64: 3, 8, 1>}, {pipeline_mode = #tpu.pipeline_mode<synchronous>, transform_indices = @transform_7, window_bounds = array<i64: 3, 4, 72>}, {pipeline_mode = #tpu.pipeline_mode<synchronous>, transform_indices = @transform_8, window_bounds = array<i64: 3, 4, 1>}, {transform_indices = @transform_9, window_bounds = array<i64: 1, 16, 256>}]} {
    %cst = arith.constant 0.000000e+00 : f32
    %0 = vector.broadcast %cst : f32 to vector<16x256xf32>
    %c0 = arith.constant 0 : index
    %c0_0 = arith.constant 0 : index
    %c0_1 = arith.constant 0 : index
    %1 = vector.load %arg10[%c0, %c0_0, %c0_1] : memref<1x16x256xf32, #tpu.memory_space<vmem>>, vector<1x16x256xf32>
    %2 = vector.shape_cast %1 : vector<1x16x256xf32> to vector<16x256xf32>
    %3 = vector.shape_cast %0 : vector<16x256xf32> to vector<1x16x256xf32>
    tpu.vector_store %arg10[%c0, %c0_0, %c0_1], %3 {strides = array<i32>} : memref<1x16x256xf32, #tpu.memory_space<vmem>>, vector<1x16x256xf32>,
    %c0_2 = arith.constant 0 : index
    %c0_3 = arith.constant 0 : index
    %c0_4 = arith.constant 0 : index
    %4 = vector.load %arg1[%c0_2, %c0_3, %c0_4] : memref<1x4x256xf32, #tpu.memory_space<vmem>>, vector<1x4x256xf32>
    %5 = vector.shape_cast %4 : vector<1x4x256xf32> to vector<4x256xf32>
    %c0_5 = arith.constant 0 : index
    %c0_6 = arith.constant 0 : index
    %c0_7 = arith.constant 0 : index
    %6 = vector.load %arg10[%c0_5, %c0_6, %c0_7] : memref<1x16x256xf32, #tpu.memory_space<vmem>>, vector<1x4x256xf32>
    %7 = vector.shape_cast %6 : vector<1x4x256xf32> to vector<4x256xf32>
    %8 = vector.shape_cast %5 : vector<4x256xf32> to vector<1x4x256xf32>
    tpu.vector_store %arg10[%c0_5, %c0_6, %c0_7], %8 {strides = array<i32>} : memref<1x16x256xf32, #tpu.memory_space<vmem>>, vector<1x4x256xf32>,
    %c0_8 = arith.constant 0 : index
    %c0_9 = arith.constant 0 : index
    %c0_10 = arith.constant 0 : index
    %9 = vector.load %arg2[%c0_8, %c0_9, %c0_10] : memref<9x1x256xf32, #tpu.memory_space<vmem>>, vector<1x1x256xf32>
    %10 = vector.shape_cast %9 : vector<1x1x256xf32> to vector<1x256xf32>
    %c1 = arith.constant 1 : index
    %c0_11 = arith.constant 0 : index
    %c0_12 = arith.constant 0 : index
    %11 = vector.load %arg2[%c1, %c0_11, %c0_12] : memref<9x1x256xf32, #tpu.memory_space<vmem>>, vector<1x1x256xf32>
    %12 = vector.shape_cast %11 : vector<1x1x256xf32> to vector<1x256xf32>
    %c2 = arith.constant 2 : index
    %c0_13 = arith.constant 0 : index
    %c0_14 = arith.constant 0 : index
    %13 = vector.load %arg2[%c2, %c0_13, %c0_14] : memref<9x1x256xf32, #tpu.memory_space<vmem>>, vector<1x1x256xf32>
    %14 = vector.shape_cast %13 : vector<1x1x256xf32> to vector<1x256xf32>
    %c3 = arith.constant 3 : index
    %c0_15 = arith.constant 0 : index
    %c0_16 = arith.constant 0 : index
    %15 = vector.load %arg2[%c3, %c0_15, %c0_16] : memref<9x1x256xf32, #tpu.memory_space<vmem>>, vector<1x1x256xf32>
    %16 = vector.shape_cast %15 : vector<1x1x256xf32> to vector<1x256xf32>
    %c4 = arith.constant 4 : index
    %c0_17 = arith.constant 0 : index
    %c0_18 = arith.constant 0 : index
    %17 = vector.load %arg2[%c4, %c0_17, %c0_18] : memref<9x1x256xf32, #tpu.memory_space<vmem>>, vector<1x1x256xf32>
    %18 = vector.shape_cast %17 : vector<1x1x256xf32> to vector<1x256xf32>
    %c5 = arith.constant 5 : index
    %c0_19 = arith.constant 0 : index
    %c0_20 = arith.constant 0 : index
    %19 = vector.load %arg2[%c5, %c0_19, %c0_20] : memref<9x1x256xf32, #tpu.memory_space<vmem>>, vector<1x1x256xf32>
    %20 = vector.shape_cast %19 : vector<1x1x256xf32> to vector<1x256xf32>
    %c6 = arith.constant 6 : index
    %c0_21 = arith.constant 0 : index
    %c0_22 = arith.constant 0 : index
    %21 = vector.load %arg2[%c6, %c0_21, %c0_22] : memref<9x1x256xf32, #tpu.memory_space<vmem>>, vector<1x1x256xf32>
    %22 = vector.shape_cast %21 : vector<1x1x256xf32> to vector<1x256xf32>
    %c7 = arith.constant 7 : index
    %c0_23 = arith.constant 0 : index
    %c0_24 = arith.constant 0 : index
    %23 = vector.load %arg2[%c7, %c0_23, %c0_24] : memref<9x1x256xf32, #tpu.memory_space<vmem>>, vector<1x1x256xf32>
    %24 = vector.shape_cast %23 : vector<1x1x256xf32> to vector<1x256xf32>
    %c8 = arith.constant 8 : index
    %c0_25 = arith.constant 0 : index
    %c0_26 = arith.constant 0 : index
    %25 = vector.load %arg2[%c8, %c0_25, %c0_26] : memref<9x1x256xf32, #tpu.memory_space<vmem>>, vector<1x1x256xf32>
    %26 = vector.shape_cast %25 : vector<1x1x256xf32> to vector<1x256xf32>
    %c0_27 = arith.constant 0 : index
    %c0_28 = arith.constant 0 : index
    %c0_29 = arith.constant 0 : index
    %27 = vector.load %arg10[%c0_27, %c0_28, %c0_29] : memref<1x16x256xf32, #tpu.memory_space<vmem>>, vector<1x16x256xf32>
    %28 = vector.shape_cast %27 : vector<1x16x256xf32> to vector<16x256xf32>
    %c0_30 = arith.constant 0 : index
    %c0_31 = arith.constant 0 : index
    %c0_32 = arith.constant 0 : index
    %29 = vector.load %arg3[%c0_30, %c0_31, %c0_32] : memref<3x16x1xf32, #tpu.memory_space<vmem>>, vector<1x16x1xf32>
    %30 = vector.shape_cast %29 : vector<1x16x1xf32> to vector<16x1xf32>
    %31 = vector.broadcast %30 : vector<16x1xf32> to vector<16x256xf32>
    %32 = arith.mulf %28, %31 : vector<16x256xf32>
    %c0_33 = arith.constant 0 : index
    %c0_34 = arith.constant 0 : index
    %c0_35 = arith.constant 0 : index
    %33 = vector.load %arg4[%c0_33, %c0_34, %c0_35] : memref<3x16x1xf32, #tpu.memory_space<vmem>>, vector<1x16x1xf32>
    %34 = vector.shape_cast %33 : vector<1x16x1xf32> to vector<16x1xf32>
    %35 = vector.broadcast %34 : vector<16x1xf32> to vector<16x256xf32>
    %36 = arith.addf %32, %35 : vector<16x256xf32>
    %cst_36 = arith.constant 0.000000e+00 : f32
    %37 = vector.broadcast %cst_36 : f32 to vector<16x256xf32>
    %38 = arith.maximumf %36, %37 : vector<16x256xf32>
    %c0_37 = arith.constant 0 : index
    %c0_38 = arith.constant 0 : index
    %c0_39 = arith.constant 0 : index
    %39 = vector.load %arg5[%c0_37, %c0_38, %c0_39] : memref<3x8x16xf32, #tpu.memory_space<vmem>>, vector<1x8x16xf32>
    %40 = vector.shape_cast %39 : vector<1x8x16xf32> to vector<8x16xf32>
    %cst_40 = arith.constant dense<0.000000e+00> : vector<8x256xf32>
    %41 = tpu.matmul %40, %38, %cst_40 {dimension_numbers = #tpu.dot_dimension_numbers<[1], [0], [0], [1], [0, 0, 1, 1], [], []>} : vector<8x16xf32>, vector<16x256xf32>, vector<8x256xf32> -> vector<8x256xf32>
    %c0_41 = arith.constant 0 : index
    %c0_42 = arith.constant 0 : index
    %c0_43 = arith.constant 0 : index
    %42 = vector.load %arg6[%c0_41, %c0_42, %c0_43] : memref<3x8x1xf32, #tpu.memory_space<vmem>>, vector<1x8x1xf32>
    %43 = vector.shape_cast %42 : vector<1x8x1xf32> to vector<8x1xf32>
    %44 = vector.broadcast %43 : vector<8x1xf32> to vector<8x256xf32>
    %45 = arith.mulf %41, %44 : vector<8x256xf32>
    %c0_44 = arith.constant 0 : index
    %c0_45 = arith.constant 0 : index
    %c0_46 = arith.constant 0 : index
    %46 = vector.load %arg7[%c0_44, %c0_45, %c0_46] : memref<3x8x1xf32, #tpu.memory_space<vmem>>, vector<1x8x1xf32>
    %47 = vector.shape_cast %46 : vector<1x8x1xf32> to vector<8x1xf32>
    %48 = vector.broadcast %47 : vector<8x1xf32> to vector<8x256xf32>
    %49 = arith.addf %45, %48 : vector<8x256xf32>
    %cst_47 = arith.constant 0.000000e+00 : f32
    %50 = vector.broadcast %cst_47 : f32 to vector<8x256xf32>
    %51 = arith.maximumf %49, %50 : vector<8x256xf32>
    %c17_i32 = arith.constant 17 : i32
    %52 = tpu.dynamic_rotate %51 by %c17_i32 dim 1 : vector<8x256xf32>, i32 -> vector<8x256xf32>
    %53 = vector.broadcast %10 : vector<1x256xf32> to vector<8x256xf32>
    %54 = arith.mulf %52, %53 : vector<8x256xf32>
    %c16_i32 = arith.constant 16 : i32
    %55 = tpu.dynamic_rotate %51 by %c16_i32 dim 1 : vector<8x256xf32>, i32 -> vector<8x256xf32>
    %56 = vector.broadcast %12 : vector<1x256xf32> to vector<8x256xf32>
    %57 = arith.mulf %55, %56 : vector<8x256xf32>
    %c15_i32 = arith.constant 15 : i32
    %58 = tpu.dynamic_rotate %51 by %c15_i32 dim 1 : vector<8x256xf32>, i32 -> vector<8x256xf32>
    %59 = vector.broadcast %14 : vector<1x256xf32> to vector<8x256xf32>
    %60 = arith.mulf %58, %59 : vector<8x256xf32>
    %c1_i32 = arith.constant 1 : i32
    %61 = tpu.dynamic_rotate %51 by %c1_i32 dim 1 : vector<8x256xf32>, i32 -> vector<8x256xf32>
    %62 = vector.broadcast %16 : vector<1x256xf32> to vector<8x256xf32>
    %63 = arith.mulf %61, %62 : vector<8x256xf32>
    %64 = vector.broadcast %18 : vector<1x256xf32> to vector<8x256xf32>
    %65 = arith.mulf %51, %64 : vector<8x256xf32>
    %c255_i32 = arith.constant 255 : i32
    %66 = tpu.dynamic_rotate %51 by %c255_i32 dim 1 : vector<8x256xf32>, i32 -> vector<8x256xf32>
    %67 = vector.broadcast %20 : vector<1x256xf32> to vector<8x256xf32>
    %68 = arith.mulf %66, %67 : vector<8x256xf32>
    %c241_i32 = arith.constant 241 : i32
    %69 = tpu.dynamic_rotate %51 by %c241_i32 dim 1 : vector<8x256xf32>, i32 -> vector<8x256xf32>
    %70 = vector.broadcast %22 : vector<1x256xf32> to vector<8x256xf32>
    %71 = arith.mulf %69, %70 : vector<8x256xf32>
    %c240_i32 = arith.constant 240 : i32
    %72 = tpu.dynamic_rotate %51 by %c240_i32 dim 1 : vector<8x256xf32>, i32 -> vector<8x256xf32>
    %73 = vector.broadcast %24 : vector<1x256xf32> to vector<8x256xf32>
    %74 = arith.mulf %72, %73 : vector<8x256xf32>
    %c239_i32 = arith.constant 239 : i32
    %75 = tpu.dynamic_rotate %51 by %c239_i32 dim 1 : vector<8x256xf32>, i32 -> vector<8x256xf32>
    %76 = vector.broadcast %26 : vector<1x256xf32> to vector<8x256xf32>
    %77 = arith.mulf %75, %76 : vector<8x256xf32>
    %78 = tpu.concatenate %54, %57, %60, %63, %65, %68, %71, %74, %77 in 0 : vector<8x256xf32>, vector<8x256xf32>, vector<8x256xf32>, vector<8x256xf32>, vector<8x256xf32>, vector<8x256xf32>, vector<8x256xf32>, vector<8x256xf32>, vector<8x256xf32> -> vector<72x256xf32>
    %c0_48 = arith.constant 0 : index
    %c0_49 = arith.constant 0 : index
    %c0_50 = arith.constant 0 : index
    %79 = vector.load %arg8[%c0_48, %c0_49, %c0_50] : memref<3x4x72xf32, #tpu.memory_space<vmem>>, vector<1x4x72xf32>
    %80 = vector.shape_cast %79 : vector<1x4x72xf32> to vector<4x72xf32>
    %cst_51 = arith.constant dense<0.000000e+00> : vector<4x256xf32>
    %81 = tpu.matmul %80, %78, %cst_51 {dimension_numbers = #tpu.dot_dimension_numbers<[1], [0], [0], [1], [0, 0, 1, 1], [], []>} : vector<4x72xf32>, vector<72x256xf32>, vector<4x256xf32> -> vector<4x256xf32>
    %c0_52 = arith.constant 0 : index
    %c0_53 = arith.constant 0 : index
    %c0_54 = arith.constant 0 : index
    %82 = vector.load %arg9[%c0_52, %c0_53, %c0_54] : memref<3x4x1xf32, #tpu.memory_space<vmem>>, vector<1x4x1xf32>
    %83 = vector.shape_cast %82 : vector<1x4x1xf32> to vector<4x1xf32>
    %84 = vector.broadcast %83 : vector<4x1xf32> to vector<4x256xf32>
    %85 = arith.addf %81, %84 : vector<4x256xf32>
    %c0_55 = arith.constant 0 : index
    %c4_56 = arith.constant 4 : index
    %c0_57 = arith.constant 0 : index
    %86 = vector.load %arg10[%c0_55, %c4_56, %c0_57] : memref<1x16x256xf32, #tpu.memory_space<vmem>>, vector<1x4x256xf32>
    %87 = vector.shape_cast %86 : vector<1x4x256xf32> to vector<4x256xf32>
    %88 = vector.shape_cast %85 : vector<4x256xf32> to vector<1x4x256xf32>
    tpu.vector_store %arg10[%c0_55, %c4_56, %c0_57], %88 {strides = array<i32>} : memref<1x16x256xf32, #tpu.memory_space<vmem>>, vector<1x4x256xf32>,
    %c0_58 = arith.constant 0 : index
    %c0_59 = arith.constant 0 : index
    %c0_60 = arith.constant 0 : index
    %89 = vector.load %arg10[%c0_58, %c0_59, %c0_60] : memref<1x16x256xf32, #tpu.memory_space<vmem>>, vector<1x16x256xf32>
    %90 = vector.shape_cast %89 : vector<1x16x256xf32> to vector<16x256xf32>
    %c1_61 = arith.constant 1 : index
    %c0_62 = arith.constant 0 : index
    %c0_63 = arith.constant 0 : index
    %91 = vector.load %arg3[%c1_61, %c0_62, %c0_63] : memref<3x16x1xf32, #tpu.memory_space<vmem>>, vector<1x16x1xf32>
    %92 = vector.shape_cast %91 : vector<1x16x1xf32> to vector<16x1xf32>
    %93 = vector.broadcast %92 : vector<16x1xf32> to vector<16x256xf32>
    %94 = arith.mulf %90, %93 : vector<16x256xf32>
    %c1_64 = arith.constant 1 : index
    %c0_65 = arith.constant 0 : index
    %c0_66 = arith.constant 0 : index
    %95 = vector.load %arg4[%c1_64, %c0_65, %c0_66] : memref<3x16x1xf32, #tpu.memory_space<vmem>>, vector<1x16x1xf32>
    %96 = vector.shape_cast %95 : vector<1x16x1xf32> to vector<16x1xf32>
    %97 = vector.broadcast %96 : vector<16x1xf32> to vector<16x256xf32>
    %98 = arith.addf %94, %97 : vector<16x256xf32>
    %cst_67 = arith.constant 0.000000e+00 : f32
    %99 = vector.broadcast %cst_67 : f32 to vector<16x256xf32>
    %100 = arith.maximumf %98, %99 : vector<16x256xf32>
    %c1_68 = arith.constant 1 : index
    %c0_69 = arith.constant 0 : index
    %c0_70 = arith.constant 0 : index
    %101 = vector.load %arg5[%c1_68, %c0_69, %c0_70] : memref<3x8x16xf32, #tpu.memory_space<vmem>>, vector<1x8x16xf32>
    %102 = vector.shape_cast %101 : vector<1x8x16xf32> to vector<8x16xf32>
    %cst_71 = arith.constant dense<0.000000e+00> : vector<8x256xf32>
    %103 = tpu.matmul %102, %100, %cst_71 {dimension_numbers = #tpu.dot_dimension_numbers<[1], [0], [0], [1], [0, 0, 1, 1], [], []>} : vector<8x16xf32>, vector<16x256xf32>, vector<8x256xf32> -> vector<8x256xf32>
    %c1_72 = arith.constant 1 : index
    %c0_73 = arith.constant 0 : index
    %c0_74 = arith.constant 0 : index
    %104 = vector.load %arg6[%c1_72, %c0_73, %c0_74] : memref<3x8x1xf32, #tpu.memory_space<vmem>>, vector<1x8x1xf32>
    %105 = vector.shape_cast %104 : vector<1x8x1xf32> to vector<8x1xf32>
    %106 = vector.broadcast %105 : vector<8x1xf32> to vector<8x256xf32>
    %107 = arith.mulf %103, %106 : vector<8x256xf32>
    %c1_75 = arith.constant 1 : index
    %c0_76 = arith.constant 0 : index
    %c0_77 = arith.constant 0 : index
    %108 = vector.load %arg7[%c1_75, %c0_76, %c0_77] : memref<3x8x1xf32, #tpu.memory_space<vmem>>, vector<1x8x1xf32>
    %109 = vector.shape_cast %108 : vector<1x8x1xf32> to vector<8x1xf32>
    %110 = vector.broadcast %109 : vector<8x1xf32> to vector<8x256xf32>
    %111 = arith.addf %107, %110 : vector<8x256xf32>
    %cst_78 = arith.constant 0.000000e+00 : f32
    %112 = vector.broadcast %cst_78 : f32 to vector<8x256xf32>
    %113 = arith.maximumf %111, %112 : vector<8x256xf32>
    %c17_i32_79 = arith.constant 17 : i32
    %114 = tpu.dynamic_rotate %113 by %c17_i32_79 dim 1 : vector<8x256xf32>, i32 -> vector<8x256xf32>
    %115 = vector.broadcast %10 : vector<1x256xf32> to vector<8x256xf32>
    %116 = arith.mulf %114, %115 : vector<8x256xf32>
    %c16_i32_80 = arith.constant 16 : i32
    %117 = tpu.dynamic_rotate %113 by %c16_i32_80 dim 1 : vector<8x256xf32>, i32 -> vector<8x256xf32>
    %118 = vector.broadcast %12 : vector<1x256xf32> to vector<8x256xf32>
    %119 = arith.mulf %117, %118 : vector<8x256xf32>
    %c15_i32_81 = arith.constant 15 : i32
    %120 = tpu.dynamic_rotate %113 by %c15_i32_81 dim 1 : vector<8x256xf32>, i32 -> vector<8x256xf32>
    %121 = vector.broadcast %14 : vector<1x256xf32> to vector<8x256xf32>
    %122 = arith.mulf %120, %121 : vector<8x256xf32>
    %c1_i32_82 = arith.constant 1 : i32
    %123 = tpu.dynamic_rotate %113 by %c1_i32_82 dim 1 : vector<8x256xf32>, i32 -> vector<8x256xf32>
    %124 = vector.broadcast %16 : vector<1x256xf32> to vector<8x256xf32>
    %125 = arith.mulf %123, %124 : vector<8x256xf32>
    %126 = vector.broadcast %18 : vector<1x256xf32> to vector<8x256xf32>
    %127 = arith.mulf %113, %126 : vector<8x256xf32>
    %c255_i32_83 = arith.constant 255 : i32
    %128 = tpu.dynamic_rotate %113 by %c255_i32_83 dim 1 : vector<8x256xf32>, i32 -> vector<8x256xf32>
    %129 = vector.broadcast %20 : vector<1x256xf32> to vector<8x256xf32>
    %130 = arith.mulf %128, %129 : vector<8x256xf32>
    %c241_i32_84 = arith.constant 241 : i32
    %131 = tpu.dynamic_rotate %113 by %c241_i32_84 dim 1 : vector<8x256xf32>, i32 -> vector<8x256xf32>
    %132 = vector.broadcast %22 : vector<1x256xf32> to vector<8x256xf32>
    %133 = arith.mulf %131, %132 : vector<8x256xf32>
    %c240_i32_85 = arith.constant 240 : i32
    %134 = tpu.dynamic_rotate %113 by %c240_i32_85 dim 1 : vector<8x256xf32>, i32 -> vector<8x256xf32>
    %135 = vector.broadcast %24 : vector<1x256xf32> to vector<8x256xf32>
    %136 = arith.mulf %134, %135 : vector<8x256xf32>
    %c239_i32_86 = arith.constant 239 : i32
    %137 = tpu.dynamic_rotate %113 by %c239_i32_86 dim 1 : vector<8x256xf32>, i32 -> vector<8x256xf32>
    %138 = vector.broadcast %26 : vector<1x256xf32> to vector<8x256xf32>
    %139 = arith.mulf %137, %138 : vector<8x256xf32>
    %140 = tpu.concatenate %116, %119, %122, %125, %127, %130, %133, %136, %139 in 0 : vector<8x256xf32>, vector<8x256xf32>, vector<8x256xf32>, vector<8x256xf32>, vector<8x256xf32>, vector<8x256xf32>, vector<8x256xf32>, vector<8x256xf32>, vector<8x256xf32> -> vector<72x256xf32>
    %c1_87 = arith.constant 1 : index
    %c0_88 = arith.constant 0 : index
    %c0_89 = arith.constant 0 : index
    %141 = vector.load %arg8[%c1_87, %c0_88, %c0_89] : memref<3x4x72xf32, #tpu.memory_space<vmem>>, vector<1x4x72xf32>
    %142 = vector.shape_cast %141 : vector<1x4x72xf32> to vector<4x72xf32>
    %cst_90 = arith.constant dense<0.000000e+00> : vector<4x256xf32>
    %143 = tpu.matmul %142, %140, %cst_90 {dimension_numbers = #tpu.dot_dimension_numbers<[1], [0], [0], [1], [0, 0, 1, 1], [], []>} : vector<4x72xf32>, vector<72x256xf32>, vector<4x256xf32> -> vector<4x256xf32>
    %c1_91 = arith.constant 1 : index
    %c0_92 = arith.constant 0 : index
    %c0_93 = arith.constant 0 : index
    %144 = vector.load %arg9[%c1_91, %c0_92, %c0_93] : memref<3x4x1xf32, #tpu.memory_space<vmem>>, vector<1x4x1xf32>
    %145 = vector.shape_cast %144 : vector<1x4x1xf32> to vector<4x1xf32>
    %146 = vector.broadcast %145 : vector<4x1xf32> to vector<4x256xf32>
    %147 = arith.addf %143, %146 : vector<4x256xf32>
    %c0_94 = arith.constant 0 : index
    %c8_95 = arith.constant 8 : index
    %c0_96 = arith.constant 0 : index
    %148 = vector.load %arg10[%c0_94, %c8_95, %c0_96] : memref<1x16x256xf32, #tpu.memory_space<vmem>>, vector<1x4x256xf32>
    %149 = vector.shape_cast %148 : vector<1x4x256xf32> to vector<4x256xf32>
    %150 = vector.shape_cast %147 : vector<4x256xf32> to vector<1x4x256xf32>
    tpu.vector_store %arg10[%c0_94, %c8_95, %c0_96], %150 {strides = array<i32>} : memref<1x16x256xf32, #tpu.memory_space<vmem>>, vector<1x4x256xf32>,
    %c0_97 = arith.constant 0 : index
    %c0_98 = arith.constant 0 : index
    %c0_99 = arith.constant 0 : index
    %151 = vector.load %arg10[%c0_97, %c0_98, %c0_99] : memref<1x16x256xf32, #tpu.memory_space<vmem>>, vector<1x16x256xf32>
    %152 = vector.shape_cast %151 : vector<1x16x256xf32> to vector<16x256xf32>
    %c2_100 = arith.constant 2 : index
    %c0_101 = arith.constant 0 : index
    %c0_102 = arith.constant 0 : index
    %153 = vector.load %arg3[%c2_100, %c0_101, %c0_102] : memref<3x16x1xf32, #tpu.memory_space<vmem>>, vector<1x16x1xf32>
    %154 = vector.shape_cast %153 : vector<1x16x1xf32> to vector<16x1xf32>
    %155 = vector.broadcast %154 : vector<16x1xf32> to vector<16x256xf32>
    %156 = arith.mulf %152, %155 : vector<16x256xf32>
    %c2_103 = arith.constant 2 : index
    %c0_104 = arith.constant 0 : index
    %c0_105 = arith.constant 0 : index
    %157 = vector.load %arg4[%c2_103, %c0_104, %c0_105] : memref<3x16x1xf32, #tpu.memory_space<vmem>>, vector<1x16x1xf32>
    %158 = vector.shape_cast %157 : vector<1x16x1xf32> to vector<16x1xf32>
    %159 = vector.broadcast %158 : vector<16x1xf32> to vector<16x256xf32>
    %160 = arith.addf %156, %159 : vector<16x256xf32>
    %cst_106 = arith.constant 0.000000e+00 : f32
    %161 = vector.broadcast %cst_106 : f32 to vector<16x256xf32>
    %162 = arith.maximumf %160, %161 : vector<16x256xf32>
    %c2_107 = arith.constant 2 : index
    %c0_108 = arith.constant 0 : index
    %c0_109 = arith.constant 0 : index
    %163 = vector.load %arg5[%c2_107, %c0_108, %c0_109] : memref<3x8x16xf32, #tpu.memory_space<vmem>>, vector<1x8x16xf32>
    %164 = vector.shape_cast %163 : vector<1x8x16xf32> to vector<8x16xf32>
    %cst_110 = arith.constant dense<0.000000e+00> : vector<8x256xf32>
    %165 = tpu.matmul %164, %162, %cst_110 {dimension_numbers = #tpu.dot_dimension_numbers<[1], [0], [0], [1], [0, 0, 1, 1], [], []>} : vector<8x16xf32>, vector<16x256xf32>, vector<8x256xf32> -> vector<8x256xf32>
    %c2_111 = arith.constant 2 : index
    %c0_112 = arith.constant 0 : index
    %c0_113 = arith.constant 0 : index
    %166 = vector.load %arg6[%c2_111, %c0_112, %c0_113] : memref<3x8x1xf32, #tpu.memory_space<vmem>>, vector<1x8x1xf32>
    %167 = vector.shape_cast %166 : vector<1x8x1xf32> to vector<8x1xf32>
    %168 = vector.broadcast %167 : vector<8x1xf32> to vector<8x256xf32>
    %169 = arith.mulf %165, %168 : vector<8x256xf32>
    %c2_114 = arith.constant 2 : index
    %c0_115 = arith.constant 0 : index
    %c0_116 = arith.constant 0 : index
    %170 = vector.load %arg7[%c2_114, %c0_115, %c0_116] : memref<3x8x1xf32, #tpu.memory_space<vmem>>, vector<1x8x1xf32>
    %171 = vector.shape_cast %170 : vector<1x8x1xf32> to vector<8x1xf32>
    %172 = vector.broadcast %171 : vector<8x1xf32> to vector<8x256xf32>
    %173 = arith.addf %169, %172 : vector<8x256xf32>
    %cst_117 = arith.constant 0.000000e+00 : f32
    %174 = vector.broadcast %cst_117 : f32 to vector<8x256xf32>
    %175 = arith.maximumf %173, %174 : vector<8x256xf32>
    %c17_i32_118 = arith.constant 17 : i32
    %176 = tpu.dynamic_rotate %175 by %c17_i32_118 dim 1 : vector<8x256xf32>, i32 -> vector<8x256xf32>
    %177 = vector.broadcast %10 : vector<1x256xf32> to vector<8x256xf32>
    %178 = arith.mulf %176, %177 : vector<8x256xf32>
    %c16_i32_119 = arith.constant 16 : i32
    %179 = tpu.dynamic_rotate %175 by %c16_i32_119 dim 1 : vector<8x256xf32>, i32 -> vector<8x256xf32>
    %180 = vector.broadcast %12 : vector<1x256xf32> to vector<8x256xf32>
    %181 = arith.mulf %179, %180 : vector<8x256xf32>
    %c15_i32_120 = arith.constant 15 : i32
    %182 = tpu.dynamic_rotate %175 by %c15_i32_120 dim 1 : vector<8x256xf32>, i32 -> vector<8x256xf32>
    %183 = vector.broadcast %14 : vector<1x256xf32> to vector<8x256xf32>
    %184 = arith.mulf %182, %183 : vector<8x256xf32>
    %c1_i32_121 = arith.constant 1 : i32
    %185 = tpu.dynamic_rotate %175 by %c1_i32_121 dim 1 : vector<8x256xf32>, i32 -> vector<8x256xf32>
    %186 = vector.broadcast %16 : vector<1x256xf32> to vector<8x256xf32>
    %187 = arith.mulf %185, %186 : vector<8x256xf32>
    %188 = vector.broadcast %18 : vector<1x256xf32> to vector<8x256xf32>
    %189 = arith.mulf %175, %188 : vector<8x256xf32>
    %c255_i32_122 = arith.constant 255 : i32
    %190 = tpu.dynamic_rotate %175 by %c255_i32_122 dim 1 : vector<8x256xf32>, i32 -> vector<8x256xf32>
    %191 = vector.broadcast %20 : vector<1x256xf32> to vector<8x256xf32>
    %192 = arith.mulf %190, %191 : vector<8x256xf32>
    %c241_i32_123 = arith.constant 241 : i32
    %193 = tpu.dynamic_rotate %175 by %c241_i32_123 dim 1 : vector<8x256xf32>, i32 -> vector<8x256xf32>
    %194 = vector.broadcast %22 : vector<1x256xf32> to vector<8x256xf32>
    %195 = arith.mulf %193, %194 : vector<8x256xf32>
    %c240_i32_124 = arith.constant 240 : i32
    %196 = tpu.dynamic_rotate %175 by %c240_i32_124 dim 1 : vector<8x256xf32>, i32 -> vector<8x256xf32>
    %197 = vector.broadcast %24 : vector<1x256xf32> to vector<8x256xf32>
    %198 = arith.mulf %196, %197 : vector<8x256xf32>
    %c239_i32_125 = arith.constant 239 : i32
    %199 = tpu.dynamic_rotate %175 by %c239_i32_125 dim 1 : vector<8x256xf32>, i32 -> vector<8x256xf32>
    %200 = vector.broadcast %26 : vector<1x256xf32> to vector<8x256xf32>
    %201 = arith.mulf %199, %200 : vector<8x256xf32>
    %202 = tpu.concatenate %178, %181, %184, %187, %189, %192, %195, %198, %201 in 0 : vector<8x256xf32>, vector<8x256xf32>, vector<8x256xf32>, vector<8x256xf32>, vector<8x256xf32>, vector<8x256xf32>, vector<8x256xf32>, vector<8x256xf32>, vector<8x256xf32> -> vector<72x256xf32>
    %c2_126 = arith.constant 2 : index
    %c0_127 = arith.constant 0 : index
    %c0_128 = arith.constant 0 : index
    %203 = vector.load %arg8[%c2_126, %c0_127, %c0_128] : memref<3x4x72xf32, #tpu.memory_space<vmem>>, vector<1x4x72xf32>
    %204 = vector.shape_cast %203 : vector<1x4x72xf32> to vector<4x72xf32>
    %cst_129 = arith.constant dense<0.000000e+00> : vector<4x256xf32>
    %205 = tpu.matmul %204, %202, %cst_129 {dimension_numbers = #tpu.dot_dimension_numbers<[1], [0], [0], [1], [0, 0, 1, 1], [], []>} : vector<4x72xf32>, vector<72x256xf32>, vector<4x256xf32> -> vector<4x256xf32>
    %c2_130 = arith.constant 2 : index
    %c0_131 = arith.constant 0 : index
    %c0_132 = arith.constant 0 : index
    %206 = vector.load %arg9[%c2_130, %c0_131, %c0_132] : memref<3x4x1xf32, #tpu.memory_space<vmem>>, vector<1x4x1xf32>
    %207 = vector.shape_cast %206 : vector<1x4x1xf32> to vector<4x1xf32>
    %208 = vector.broadcast %207 : vector<4x1xf32> to vector<4x256xf32>
    %209 = arith.addf %205, %208 : vector<4x256xf32>
    %c0_133 = arith.constant 0 : index
    %c12 = arith.constant 12 : index
    %c0_134 = arith.constant 0 : index
    %210 = vector.load %arg10[%c0_133, %c12, %c0_134] : memref<1x16x256xf32, #tpu.memory_space<vmem>>, vector<1x4x256xf32>
    %211 = vector.shape_cast %210 : vector<1x4x256xf32> to vector<4x256xf32>
    %212 = vector.shape_cast %209 : vector<4x256xf32> to vector<1x4x256xf32>
    tpu.vector_store %arg10[%c0_133, %c12, %c0_134], %212 {strides = array<i32>} : memref<1x16x256xf32, #tpu.memory_space<vmem>>, vector<1x4x256xf32>,
    return
  }
  func.func @transform_0(%arg0: i32) -> (i32, i32, i32) {
    %c0_i32 = arith.constant 0 : i32
    %c0_i32_0 = arith.constant 0 : i32
    %c0_i32_1 = arith.constant 0 : i32
    return %arg0, %c0_i32, %c0_i32_0 : i32, i32, i32
  }
  func.func @transform_1(%arg0: i32) -> (i32, i32, i32) {
    %c0_i32 = arith.constant 0 : i32
    %c0_i32_0 = arith.constant 0 : i32
    %c0_i32_1 = arith.constant 0 : i32
    %c0_i32_2 = arith.constant 0 : i32
    return %c0_i32, %c0_i32_0, %c0_i32_1 : i32, i32, i32
  }
  func.func @transform_2(%arg0: i32) -> (i32, i32, i32) {
    %c0_i32 = arith.constant 0 : i32
    %c0_i32_0 = arith.constant 0 : i32
    %c0_i32_1 = arith.constant 0 : i32
    %c0_i32_2 = arith.constant 0 : i32
    return %c0_i32, %c0_i32_0, %c0_i32_1 : i32, i32, i32
  }
  func.func @transform_3(%arg0: i32) -> (i32, i32, i32) {
    %c0_i32 = arith.constant 0 : i32
    %c0_i32_0 = arith.constant 0 : i32
    %c0_i32_1 = arith.constant 0 : i32
    %c0_i32_2 = arith.constant 0 : i32
    return %c0_i32, %c0_i32_0, %c0_i32_1 : i32, i32, i32
  }
  func.func @transform_4(%arg0: i32) -> (i32, i32, i32) {
    %c0_i32 = arith.constant 0 : i32
    %c0_i32_0 = arith.constant 0 : i32
    %c0_i32_1 = arith.constant 0 : i32
    %c0_i32_2 = arith.constant 0 : i32
    return %c0_i32, %c0_i32_0, %c0_i32_1 : i32, i32, i32
  }
  func.func @transform_5(%arg0: i32) -> (i32, i32, i32) {
    %c0_i32 = arith.constant 0 : i32
    %c0_i32_0 = arith.constant 0 : i32
    %c0_i32_1 = arith.constant 0 : i32
    %c0_i32_2 = arith.constant 0 : i32
    return %c0_i32, %c0_i32_0, %c0_i32_1 : i32, i32, i32
  }
  func.func @transform_6(%arg0: i32) -> (i32, i32, i32) {
    %c0_i32 = arith.constant 0 : i32
    %c0_i32_0 = arith.constant 0 : i32
    %c0_i32_1 = arith.constant 0 : i32
    %c0_i32_2 = arith.constant 0 : i32
    return %c0_i32, %c0_i32_0, %c0_i32_1 : i32, i32, i32
  }
  func.func @transform_7(%arg0: i32) -> (i32, i32, i32) {
    %c0_i32 = arith.constant 0 : i32
    %c0_i32_0 = arith.constant 0 : i32
    %c0_i32_1 = arith.constant 0 : i32
    %c0_i32_2 = arith.constant 0 : i32
    return %c0_i32, %c0_i32_0, %c0_i32_1 : i32, i32, i32
  }
  func.func @transform_8(%arg0: i32) -> (i32, i32, i32) {
    %c0_i32 = arith.constant 0 : i32
    %c0_i32_0 = arith.constant 0 : i32
    %c0_i32_1 = arith.constant 0 : i32
    %c0_i32_2 = arith.constant 0 : i32
    return %c0_i32, %c0_i32_0, %c0_i32_1 : i32, i32, i32
  }
  func.func @transform_9(%arg0: i32) -> (i32, i32, i32) {
    %c0_i32 = arith.constant 0 : i32
    %c0_i32_0 = arith.constant 0 : i32
    %c0_i32_1 = arith.constant 0 : i32
    return %arg0, %c0_i32, %c0_i32_0 : i32, i32, i32
  }
}

</mosaic_0001>

<bundles_post_ra>
// kernel: tpu_custom_call.1
= control target key start
LH: loop header
LB: loop body
LE: loop exit
PB: predicated region body
PF: predicated region fallthrough
CT: control target
= control target key end

     0   :  { %s2273_s0 = inlined_call_operand.vmem [shape: f32[2,4,256], index: 0, kind: input, shape index: {}]   ;;  %s2274_s1 = inlined_call_operand.vmem [shape: f32[9,1,256], index: 1, kind: input, shape index: {}]   ;;  %s2275_s2 = inlined_call_operand.vmem [shape: f32[3,16,1], index: 2, kind: input, shape index: {}]   ;;  %s2276_s3 = inlined_call_operand.vmem [shape: f32[3,16,1], index: 3, kind: input, shape index: {}]   ;;  %s2277_s4 = inlined_call_operand.vmem [shape: f32[3,8,16], index: 4, kind: input, shape index: {}]   ;;  %s2278_s5 = inlined_call_operand.vmem [shape: f32[3,8,1], index: 5, kind: input, shape index: {}]   ;;  %s2279_s6 = inlined_call_operand.vmem [shape: f32[3,8,1], index: 6, kind: input, shape index: {}]   ;;  %s2280_s7 = inlined_call_operand.vmem [shape: f32[3,4,72], index: 7, kind: input, shape index: {}]   ;;  %s2281_s8 = inlined_call_operand.vmem [shape: f32[3,4,1], index: 8, kind: input, shape index: {}]   ;;  %s2282_s9 = inlined_call_operand.hbm [shape: f32[2,16,256], index: 9, kind: output, shape index: {}]  }
   0x1   :  { %2304 = sst [smem:[#allocation9_spill]] %s2273_s0 }
   0x2   :  { %2305 = sst [smem:[#allocation10_spill]] %s2274_s1 }
   0x3   :  { %14 = vsyncpa [#allocation3], 0 }
   0x4   :  { %16 = vsyncpa [#allocation3 + $0x1], 0  ;;  %s1702_s30 = smov 0   ;;  %s1704_s10 = smov 0  }
   0x5   :  { %s1706_s11 = smov 0   ;;  %s1708_s12 = smov 0  }
   0x6 LB: > { %2306 = sst [smem:[#allocation5_spill]] %s1634_s11  ;;  %s1723_s13 = sadd.s32 4294967295, %s1638_s12   ;;  %s1638_s12 = sphi %s1708_s12, %s2324_s12   ;;  %s1634_s11 = sphi %s1706_s11, %s2326_s11   ;;  %s1630_s10 = sphi %s1704_s10, %s2328_s10   ;;  %s1626_s30 = sphi %s1702_s30, %s2327_s30  }
   0x7   : > { %s1417_s14 = sadd.s32 4294967294, %s1638_s12   ;;  %s1727_s15 = sadd.s32 1, %s1638_s12  }
   0x8   : > { %2307 = sst [smem:[#allocation6_spill]] %s1727_s15  ;;  %s223_s16 = sadd.s32 1, %s1634_s11 }
   0x9   : > { %s220_s17 = ssub.s32 %s1638_s12, %s1727_s15  ;;  %p233_p0 = scmp.ne.s32.totalorder %s1634_s11, %s1630_s10 }
   0xa   : > { %p221_p1 = scmp.eq.s32.totalorder %s220_s17, 0  ;;  %p234_p2 = scmp.eq.s32.totalorder %s1723_s13, 1 }
   0xb   : > { %p239_p3 = scmp.ne.s32.totalorder %s1630_s10, %s1626_s30  ;;  %p240_p4 = scmp.eq.s32.totalorder %s1417_s14, 1 }
   0xc   : > { %s1738_s18 = scalar_select %p221_p1, %s1634_s11, %s223_s16  }
   0xd   : > { %p1740_p5 = por %p234_p2, %p233_p0  ;;  %p1744_p6 = por %p240_p4, %p239_p3 }
   0xe   : > { %2308 = sst [smem:[#allocation7_spill]] %s1738_s18  ;;  %p1420_p7 = scmp.ge.s32.totalorder %s1638_s12, 1 }
   0xf   : > { %s2310_s20 = scalar_select %p1744_p6, 1, 0 }
  0x10   : > { %p290_p8 = scmp.lt.s32.totalorder %s1638_s12, 3 }
  0x11   : > { %2311 = sst [smem:[#allocation8_spill]] %s2310_s20 }
  0x12   : > { %p291_p9 = pnand %p1420_p7, %p290_p8 }
  0x13   : > { %v378_v0 = vld [vmem:[%s2276_s3] sm:$0xff] (!%p291_p9)  ;;  %s2283_s25 = sand.u32 (!%p291_p9), 1, %s1630_s10   ;;  %p326_p10 = scmp.lt.s32.totalorder (!%p291_p9), %s1723_s13, 1  ;;  %v1640_v2 = vmov (!%p291_p9), 0   ;;  %v379_v3 = vld [vmem:[%s2276_s3 + $0x8] sm:$0xff] (!%p291_p9)  ;;  %v1641_v5 = vmov (!%p291_p9), 0.0   ;;  %v496_v45 = vlaneseq (!%p291_p9) }
  0x14   : > { %294 = sbr.rel (%p291_p9) target bundleno = 1976 (0x7b8), region = 56  ;;  %v362_v1 = vld [vmem:[%s2275_s2] sm:$0xff] (!%p291_p9)  ;;  %1574 = vset.pattern.permute.xlu1 (!%p291_p9), %v1640_v2  ;;  %1573 = vset.pattern.permute.xlu0 (!%p291_p9), %v1640_v2  ;;  %s1421_s26 = sshll.u32 (!%p291_p9), %s2283_s25, 5  ;;  %v363_v4 = vld [vmem:[%s2275_s2 + $0x8] sm:$0xff] (!%p291_p9)  ;;  %vm399_vm0 = vcmask (!%p291_p9), 130048   ;;  %v1434_v39 = vld [vmem:[%s2275_s2 + $0x10] sm:$0xff] (!%p291_p9) }
  0x15   : > { %382 = vperm.xlu1 (!%p291_p9), %1574, %v378_v0   ;;  %366 = vperm.xlu0 (!%p291_p9), %1573, %v362_v1   ;;  %s1767_s17 = scalar_lea.vmem (!%p291_p9), [#allocation2], %s1421_s26  ;;  %s2312_s0 = sld [smem:[#allocation9_spill]] (!%p291_p9)  ;;  %v482_v6 = vld [vmem:[%s2279_s6] sm:$0xff] (!%p291_p9)  ;;  %v1435_v40 = vld [vmem:[%s2275_s2 + $0x18] sm:$0xff] (!%p291_p9)  ;;  %v1436_v41 = vld [vmem:[%s2276_s3 + $0x10] sm:$0xff] (!%p291_p9)  ;;  %v503_v46 = vshrl.u32 (!%p291_p9), %v496_v45, 7 }
  0x16   : > { %331 = vst [vmem:[%s1767_s17] sm:$0xff] (!%p291_p9), %v1641_v5  ;;  %332 = vst [vmem:[%s1767_s17 + $0x8] sm:$0xff] (!%p291_p9), %v1641_v5  ;;  %467 = vmatprep.mubr.f32.mxu0 (!%p291_p9), %v1641_v5  ;;  %742 = vmatprep.mubr.f32.mxu1 (!%p291_p9), %v1641_v5  ;;  %v474_v7 = vld [vmem:[%s2278_s5] sm:$0xff] (!%p291_p9)  ;;  %s2296_s22 = smov (!%p291_p9), 16   ;;  %s2292_s23 = smov (!%p291_p9), 15   ;;  %v1437_v42 = vld [vmem:[%s2276_s3 + $0x18] sm:$0xff] (!%p291_p9)  ;;  %v1854_v47 = vand.u32 (!%p291_p9), 127, %v496_v45 }
  0x17   : > { %333 = vst [vmem:[%s1767_s17 + $0x10] sm:$0xff] (!%p291_p9), %v1641_v5  ;;  %334 = vst [vmem:[%s1767_s17 + $0x18] sm:$0xff] (!%p291_p9), %v1641_v5  ;;  %v398_v27 = vld [vmem:[%s2277_s4] sm:$0xff] (!%p291_p9)  ;;  %s2286_s26 = smov (!%p291_p9), 127   ;;  %s2284_s27 = smov (!%p291_p9), 113   ;;  %v1440_v43 = vld [vmem:[%s2278_s5 + $0x8] sm:$0xff] (!%p291_p9) }
  0x18   : > { %s2290_s28 = smov (!%p291_p9), 112   ;;  %s2294_s29 = smov (!%p291_p9), 111   ;;  %v668_v38 = vld [vmem:[%s2281_s8] sm:$0xf] (!%p291_p9)  ;;  %v1441_v44 = vld [vmem:[%s2279_s6 + $0x8] sm:$0xff] (!%p291_p9)  ;;  %v1859_v50 = vsub.s32 (!%p291_p9), 0, %v503_v46 }
  0x19   : > { %387 = vperm.xlu1 (!%p291_p9), %1574, %v379_v3   ;;  %371 = vperm.xlu0 (!%p291_p9), %1573, %v363_v4   ;;  %s2313_s1 = sld [smem:[#allocation10_spill]] (!%p291_p9)  ;;  %vm498_vm1 = vcmp.lt.s32.totalorder (!%p291_p9), %v1854_v47, 17  ;;  %v1865_v53 = vsub.s32 (!%p291_p9), 1, %v503_v46  ;;  %vm518_vm2 = vcmp.lt.s32.totalorder (!%p291_p9), %v1854_v47, 16  ;;  %vm538_vm3 = vcmp.lt.s32.totalorder (!%p291_p9), %v1854_v47, 15  ;;  %s2318_s14 = smov (!%p291_p9), 113  }
  0x1a   : > { %vm558_vm4 = vcmp.lt.s32.totalorder (!%p291_p9), %v1854_v47, 1  ;;  %vm591_vm5 = vcmp.lt.s32.totalorder (!%p291_p9), %v1854_v47, 127  ;;  %vm611_vm6 = vcmp.lt.s32.totalorder (!%p291_p9), %v1854_v47, 113  ;;  %vm631_vm7 = vcmp.lt.s32.totalorder (!%p291_p9), %v1854_v47, 112  ;;  %s2320_s25 = smov (!%p291_p9), 111   ;;  %s2321_s18 = smov (!%p291_p9), 17  }
  0x1b   : > { %s327_s16 = scalar_select %p326_p10, %s1723_s13, 1  ;;  %vm651_vm8 = vcmp.lt.s32.totalorder %v1854_v47, 111  ;;  %vm674_vm9 = vcmask 588800  }
  0x1d   : > { %s1461_s21 = sshll.u32 %s327_s16, 3  ;;  %485 = vperm.xlu1 %1574, %v482_v6   ;;  %477 = vperm.xlu0 %1573, %v474_v7   ;;  %s2319_s16 = smov 112  }
  0x1e   : > { %s330_s24 = scalar_lea.vmem %s2312_s0, %s1461_s21  ;;  %s2298_s21 = smov 17  }
  0x1f   : > { %v335_v8 = vld [vmem:[%s330_s24] sm:$0xff]  ;;  %s2288_s24 = smov 1   ;;  %v1430_v45 = vld [vmem:[%s2313_s1 + $0xe] sm:$0x3]  ;;  %s1650_s0 = smov [#allocation2]  }
  0x20   : > { %v337_v9 = vcombine.high %v335_v8, %v335_v8  ;;  %339 = vst [vmem:[%s1767_s17] sm:$0xf] %v335_v8  ;;  %v341_v48 = vld [vmem:[%s2313_s1] sm:$0x3]  ;;  %v1424_v51 = vld [vmem:[%s2313_s1 + $0x2] sm:$0x3] }
  0x21   : > { %v1868_v54 = vrot.slane %v341_v48, %v1859_v50  ;;  %v1872_v55 = vrot.slane %v1424_v51, %v1859_v50  ;;  %v1875_v56 = vrot.slane %v341_v48, %v1865_v53  ;;  %v1878_v57 = vrot.slane %v1424_v51, %v1865_v53  ;;  %v1425_v2 = vld [vmem:[%s2313_s1 + $0x4] sm:$0x3]  ;;  %v1426_v7 = vld [vmem:[%s2313_s1 + $0x6] sm:$0x3] }
  0x22   : > { %340 = vst [vmem:[%s1767_s17 + $0x8] sm:$0xf] %v337_v9 }
  0x27   : > { %v358_v10 = vld [vmem:[%s1767_s17] sm:$0xff] }
  0x29   : > { %v359_v11 = vld [vmem:[%s1767_s17 + $0x8] sm:$0xff] }
  0x94   : > { %v383_v12 = vpop.permute.xlu1 %382  ;;  %v367_v13 = vpop.permute.xlu0 %366 }
  0x95   : > { %v374_v14 = vmul.f32 %v367_v13, %v358_v10  ;;  %v375_v15 = vmul.f32 %v367_v13, %v359_v11  ;;  %v1900_v11 = vrot.slane %v1425_v2, %v1859_v50  ;;  %v1906_v13 = vrot.slane %v1425_v2, %v1865_v53 }
  0x97   : > { %v390_v17 = vadd.f32 %v383_v12, %v374_v14  ;;  %v391_v19 = vadd.f32 %v383_v12, %v375_v15  ;;  %v1427_v12 = vld [vmem:[%s2313_s1 + $0x8] sm:$0x3]  ;;  %v1910_v14 = vrot.slane %v1426_v7, %v1859_v50  ;;  %v1913_v15 = vrot.slane %v1426_v7, %v1865_v53 }
  0x98   : > { %v372_v16 = vpop.permute.xlu0 %371  ;;  %v388_v20 = vpop.permute.xlu1 %387 }
  0x99   : > { %v376_v18 = vmul.f32 0.0, %v372_v16  ;;  %v395_v22 = vmax.f32 %v391_v19, 0.0  ;;  %v394_v24 = vmax.f32 %v390_v17, 0.0  ;;  %v1428_v16 = vld [vmem:[%s2313_s1 + $0xa] sm:$0x3] }
  0x9b   : > { %v392_v21 = vadd.f32 %v388_v20, %v376_v18 }
  0x9c   : > { %v478_v28 = vpop.permute.xlu0 %477  ;;  %v486_v32 = vpop.permute.xlu1 %485 }
  0x9d   : > { %v397_v23 = vmax.f32 %v392_v21, 0.0  ;;  %v1924_v21 = vrot.slane %v1427_v12, %v1865_v53 }
  0x9f   : > { %v1463_v25 = vpack.c.bf16 %v397_v23, %v395_v22  ;;  %v1465_v26 = vpack.c.bf16 %v397_v23, %v394_v24  ;;  %v1927_v22 = vrot.slane %v1427_v12, %v1859_v50 }
  0xa1   : > { %1464 = vmatprep.subr.bf16.mxu0 %v1463_v25  ;;  %v1934_v25 = vrot.slane %v1428_v16, %v1859_v50 }
  0xa2   : > { %1466 = vmatpush1.bf16.msra.mxu0 %v1465_v26  ;;  %v1937_v26 = vrot.slane %v1428_v16, %v1865_v53 }
  0xa5   : > { %1432 = vmatmul.mubr.msk.f32.vlgmr.msra.gmra.mrb[0].mxu0 %vm399_vm0, %v398_v27 }
  0xa6   : > { %868 = vmatprep.mubr.f32.mxu0 %v1641_v5 }
 0x178   : > { %v469_v29 = vpop.f32.mrb[0].mxu0 }
 0x179   : > { %v480_v30 = vmul.f32 %v478_v28, %v469_v29  ;;  %v471_v31 = vpop.f32.mrb[1].mxu0 }
 0x17a   : > { %v481_v33 = vmul.f32 %v478_v28, %v471_v31 }
 0x17b   : > { %v488_v34 = vadd.f32 %v486_v32, %v480_v30 }
 0x17c   : > { %v489_v35 = vadd.f32 %v486_v32, %v481_v33 }
 0x17d   : > { %v1797_v36 = vmax.f32 %v488_v34, 0.0 }
 0x17e   : > { %v1799_v37 = vmax.f32 %v489_v35, 0.0 }
 0x17f   : > { %492 = vrot.lane.b32.xlu0 %v1797_v36, %s2298_s21 }
 0x180   : > { %494 = vrot.lane.b32.xlu1 %v1799_v37, %s2298_s21 }
 0x183   : > { %514 = vrot.lane.b32.xlu0 %v1797_v36, %s2296_s22 }
 0x184   : > { %516 = vrot.lane.b32.xlu1 %v1799_v37, %s2296_s22  ;;  %s2314_s22 = smov 16  }
 0x187   : > { %534 = vrot.lane.b32.xlu0 %v1797_v36, %s2292_s23 }
 0x188   : > { %536 = vrot.lane.b32.xlu1 %v1799_v37, %s2292_s23 }
 0x18b   : > { %554 = vrot.lane.b32.xlu0 %v1797_v36, %s2288_s24 }
 0x18c   : > { %556 = vrot.lane.b32.xlu1 %v1799_v37, %s2288_s24 }
 0x18f   : > { %587 = vrot.lane.b32.xlu0 %v1797_v36, %s2286_s26 }
 0x190   : > { %589 = vrot.lane.b32.xlu1 %v1799_v37, %s2286_s26  ;;  %s2315_s26 = smov 15  }
 0x193   : > { %607 = vrot.lane.b32.xlu0 %v1797_v36, %s2284_s27 }
 0x194   : > { %609 = vrot.lane.b32.xlu1 %v1799_v37, %s2284_s27 }
 0x197   : > { %627 = vrot.lane.b32.xlu0 %v1797_v36, %s2290_s28 }
 0x198   : > { %629 = vrot.lane.b32.xlu1 %v1799_v37, %s2290_s28  ;;  %s2316_s28 = smov 1  }
 0x19b   : > { %647 = vrot.lane.b32.xlu0 %v1797_v36, %s2294_s29 }
 0x19c   : > { %649 = vrot.lane.b32.xlu1 %v1799_v37, %s2294_s29  ;;  %s2317_s29 = smov 127  }
 0x19f   : > { %671 = vperm.xlu0 %1573, %v668_v38  }
 0x1a0   : > { %766 = vperm.xlu1 %1574, %v1434_v39  }
 0x1a3   : > { %771 = vperm.xlu0 %1573, %v1435_v40  }
 0x1a4   : > { %783 = vperm.xlu1 %1574, %v1436_v41   ;;  %v1429_v41 = vld [vmem:[%s2313_s1 + $0xc] sm:$0x3] }
 0x1a5   : > { %v1961_v51 = vrot.slane %v1429_v41, %v1859_v50 }
 0x1a7   : > { %788 = vperm.xlu0 %1573, %v1437_v42   ;;  %v586_v42 = vmul.f32 %v1924_v21, %v1799_v37  ;;  %v1971_v37 = vrot.slane %v1430_v45, %v1865_v53 }
 0x1a8   : > { %879 = vperm.xlu1 %1574, %v1440_v43   ;;  %v585_v43 = vmul.f32 %v1927_v22, %v1797_v36  ;;  %v1968_v36 = vrot.slane %v1430_v45, %v1859_v50 }
 0x1ab   : > { %888 = vperm.xlu0 %1573, %v1441_v44  }
 0x1f1   : > { %v493_v49 = vpop.permute.xlu0 %492 }
 0x1f2   : > { %v495_v52 = vpop.permute.xlu1 %494 }
 0x1f3   : > { %v499_v58 = vsel %vm498_vm1, %v493_v49, %v495_v52  ;;  %v500_v59 = vsel %vm498_vm1, %v495_v52, %v493_v49  ;;  %v1964_v52 = vrot.slane %v1429_v41, %v1865_v53 }
 0x1f4   : > { %v512_v0 = vmul.f32 %v1868_v54, %v500_v59  ;;  %v513_v3 = vmul.f32 %v1875_v56, %v499_v58  ;;  %v1431_v58 = vld [vmem:[%s2313_s1 + $0x10] sm:$0x3]  ;;  %s1580_s1 = sshll.u32 %s1650_s0, 4  ;;  %s1581_s1 = int_to_ptr.vmem [resolvable:$false] %s1580_s1 }
 0x1f5   : > { %v515_v60 = vpop.permute.xlu0 %514  ;;  %v1993_v12 = vrot.slane %v1431_v58, %v1859_v50  ;;  %v667_v50 = vld [vmem:[%s2280_s7] sm:$0xf]  ;;  %s1582_s11 = scalar_lea.vmem %s1581_s1, 1024 }
 0x1f6   : > { %v517_v61 = vpop.permute.xlu1 %516 }
 0x1f7   : > { %v519_v62 = vsel %vm518_vm2, %v515_v60, %v517_v61  ;;  %v520_v63 = vsel %vm518_vm2, %v517_v61, %v515_v60 }
 0x1f8   : > { %v532_v1 = vmul.f32 %v1872_v55, %v520_v63  ;;  %v533_v4 = vmul.f32 %v1878_v57, %v519_v62 }
 0x1f9   : > { %v535_v6 = vpop.permute.xlu0 %534 }
 0x1fa   : > { %v537_v8 = vpop.permute.xlu1 %536  ;;  %v1467_v9 = vpack.c.bf16 %v533_v4, %v513_v3  ;;  %v1469_v10 = vpack.c.bf16 %v532_v1, %v512_v0  ;;  %v1986_v1 = vrot.slane %v1431_v58, %v1865_v53  ;;  %v1438_v58 = vld [vmem:[%s2277_s4 + $0x8] sm:$0xff] }
 0x1fb   : > { %v539_v17 = vsel %vm538_vm3, %v535_v6, %v537_v8  ;;  %v540_v18 = vsel %vm538_vm3, %v537_v8, %v535_v6 }
 0x1fc   : > { %1468 = vmatprep.subr.bf16.mxu1 %v1467_v9  ;;  %v552_v27 = vmul.f32 %v1900_v11, %v540_v18  ;;  %v553_v28 = vmul.f32 %v1906_v13, %v539_v17 }
 0x1fd   : > { %v555_v19 = vpop.permute.xlu0 %554  ;;  %1470 = vmatpush1.bf16.msra.mxu1 %v1469_v10 }
 0x1fe   : > { %v557_v20 = vpop.permute.xlu1 %556 }
 0x1ff   : > { %v559_v23 = vsel %vm558_vm4, %v555_v19, %v557_v20  ;;  %v560_v24 = vsel %vm558_vm4, %v557_v20, %v555_v19 }
 0x200   : > { %v572_v29 = vmul.f32 %v1910_v14, %v560_v24  ;;  %v573_v30 = vmul.f32 %v1913_v15, %v559_v23 }
 0x201   : > { %v588_v31 = vpop.permute.xlu0 %587 }
 0x202   : > { %v590_v32 = vpop.permute.xlu1 %589  ;;  %v1471_v33 = vpack.c.bf16 %v573_v30, %v553_v28  ;;  %v1473_v34 = vpack.c.bf16 %v572_v29, %v552_v27 }
 0x203   : > { %v592_v35 = vsel %vm591_vm5, %v588_v31, %v590_v32  ;;  %v593_v38 = vsel %vm591_vm5, %v590_v32, %v588_v31 }
 0x204   : > { %v605_v39 = vmul.f32 %v1934_v25, %v592_v35  ;;  %v606_v40 = vmul.f32 %v1937_v26, %v593_v38  ;;  %1472 = vmatprep.subr.bf16.mxu1 %v1471_v33 }
 0x205   : > { %v608_v44 = vpop.permute.xlu0 %607  ;;  %1474 = vmatpush1.bf16.msra.mxu1 %v1473_v34 }
 0x206   : > { %v610_v46 = vpop.permute.xlu1 %609  ;;  %v1475_v48 = vpack.c.bf16 %v606_v40, %v586_v42  ;;  %v1477_v49 = vpack.c.bf16 %v605_v39, %v585_v43 }
 0x207   : > { %v612_v59 = vsel %vm611_vm6, %v608_v44, %v610_v46  ;;  %v613_v60 = vsel %vm611_vm6, %v610_v46, %v608_v44 }
 0x208   : > { %1476 = vmatprep.subr.bf16.mxu1 %v1475_v48  ;;  %v625_v2 = vmul.f32 %v1961_v51, %v612_v59  ;;  %v626_v3 = vmul.f32 %v1964_v52, %v613_v60 }
 0x209   : > { %v628_v61 = vpop.permute.xlu0 %627  ;;  %1478 = vmatpush1.bf16.msra.mxu1 %v1477_v49 }
 0x20a   : > { %v630_v62 = vpop.permute.xlu1 %629 }
 0x20b   : > { %v632_v63 = vsel %vm631_vm7, %v628_v61, %v630_v62  ;;  %v633_v0 = vsel %vm631_vm7, %v630_v62, %v628_v61 }
 0x20c   : > { %v645_v4 = vmul.f32 %v1968_v36, %v632_v63  ;;  %v646_v6 = vmul.f32 %v1971_v37, %v633_v0 }
 0x20d   : > { %v648_v7 = vpop.permute.xlu0 %647 }
 0x20e   : > { %v650_v8 = vpop.permute.xlu1 %649  ;;  %v1479_v9 = vpack.c.bf16 %v646_v6, %v626_v3  ;;  %v1481_v10 = vpack.c.bf16 %v645_v4, %v625_v2 }
 0x20f   : > { %v653_v16 = vsel %vm651_vm8, %v650_v8, %v648_v7  ;;  %v652_v53 = vsel %vm651_vm8, %v648_v7, %v650_v8  ;;  %v1443_v7 = vld [vmem:[%s2281_s8 + $0x4] sm:$0xf] }
 0x210   : > { %v666_v17 = vmul.f32 %v1986_v1, %v653_v16  ;;  %1480 = vmatprep.subr.bf16.mxu1 %v1479_v9  ;;  %v665_v18 = vmul.f32 %v1993_v12, %v652_v53  ;;  %v1445_v8 = vld [vmem:[%s2275_s2 + $0x20] sm:$0xff]  ;;  %v1446_v9 = vld [vmem:[%s2275_s2 + $0x28] sm:$0xff]  ;;  %v1451_v53 = vld [vmem:[%s2278_s5 + $0x10] sm:$0xff] }
 0x211   : > { %1482 = vmatpush1.bf16.msra.mxu1 %v1481_v10  ;;  %v1447_v10 = vld [vmem:[%s2276_s3 + $0x20] sm:$0xff]  ;;  %v1448_v16 = vld [vmem:[%s2276_s3 + $0x28] sm:$0xff] }
 0x212   : > { %694 = vmatprep.subr.mxu1 %v666_v17  ;;  %v1452_v17 = vld [vmem:[%s2279_s6 + $0x10] sm:$0xff] }
 0x215   : > { %695 = vmatpush1.msra.mxu1 %v665_v18 }
 0x216   : > { %1433 = vmatmul.mubr.msk.f32.vlgmr.msra.gmra.mrb[0].mxu1 %vm674_vm9, %v667_v50 }
 0x217   : > { %1326 = vmatprep.mubr.f32.mxu1 %v1641_v5 }
 0x21e   : > { %v672_v19 = vpop.permute.xlu0 %671 }
 0x21f   : > { %v767_v31 = vpop.permute.xlu1 %766 }
 0x222   : > { %v772_v30 = vpop.permute.xlu0 %771 }
 0x223   : > { %v776_v33 = vmul.f32 0.0, %v772_v30  ;;  %v784_v39 = vpop.permute.xlu1 %783 }
 0x226   : > { %v789_v32 = vpop.permute.xlu0 %788 }
 0x227   : > { %v793_v40 = vadd.f32 %v789_v32, %v776_v33  ;;  %v880_v59 = vpop.permute.xlu1 %879 }
 0x229   : > { %v797_v45 = vmax.f32 %v793_v40, 0.0 }
 0x22a   : > { %v889_v63 = vpop.permute.xlu0 %888 }
 0x2e9   : > { %v744_v20 = vpop.f32.mrb[0].mxu1 }
 0x2ea   : > { %v745_v23 = vadd.f32 %v744_v20, %v672_v19  ;;  %v746_v24 = vpop.f32.mrb[1].mxu1 }
 0x2eb   : > { %v747_v27 = vadd.f32 %v746_v24, %v672_v19 }
 0x2ec   : > { %v751_v28 = vrot.slane %v745_v23, 4 }
 0x2ed   : > { %v752_v29 = vrot.slane %v747_v27, 4 }
 0x2ee   : > { %755 = vst [vmem:[%s1767_s17] sm:$0xf0] %v751_v28 }
 0x2ef   : > { %756 = vst [vmem:[%s1767_s17 + $0x8] sm:$0xf0] %v752_v29 }
 0x2f5   : > { %v2009_v34 = vld [vmem:[%s1767_s17] sm:$0xff] }
 0x2f6   : > { %v2012_v35 = vld [vmem:[%s1767_s17 + $0x8] sm:$0xff]  ;;  %v774_v38 = vmul.f32 %v767_v31, %v2009_v34 }
 0x2f7   : > { %v775_v41 = vmul.f32 %v767_v31, %v2012_v35 }
 0x2f8   : > { %v791_v42 = vadd.f32 %v784_v39, %v774_v38 }
 0x2f9   : > { %v792_v43 = vadd.f32 %v784_v39, %v775_v41 }
 0x2fa   : > { %v795_v44 = vmax.f32 %v791_v42, 0.0 }
 0x2fb   : > { %v796_v46 = vmax.f32 %v792_v43, 0.0 }
 0x2fc   : > { %v1485_v49 = vpack.c.bf16 %v797_v45, %v795_v44 }
 0x2fd   : > { %v1483_v48 = vpack.c.bf16 %v797_v45, %v796_v46 }
 0x2ff   : > { %1484 = vmatprep.subr.bf16.mxu0 %v1483_v48 }
 0x300   : > { %1486 = vmatpush1.bf16.msra.mxu0 %v1485_v49 }
 0x303   : > { %1439 = vmatmul.mubr.msk.f32.vlgmr.msra.gmra.mrb[2].mxu0 %vm399_vm0, %v1438_v58 }
 0x304   : > { %1037 = vmatprep.mubr.f32.mxu0 %v1641_v5 }
 0x3d6   : > { %v870_v60 = vpop.f32.mrb[2].mxu0 }
 0x3d7   : > { %v882_v61 = vmul.f32 %v880_v59, %v870_v60  ;;  %v872_v62 = vpop.f32.mrb[3].mxu0 }
 0x3d8   : > { %v883_v0 = vmul.f32 %v880_v59, %v872_v62 }
 0x3d9   : > { %v891_v2 = vadd.f32 %v889_v63, %v882_v61 }
 0x3da   : > { %v892_v3 = vadd.f32 %v889_v63, %v883_v0 }
 0x3db   : > { %v2021_v4 = vmax.f32 %v891_v2, 0.0 }
 0x3dc   : > { %v2023_v6 = vmax.f32 %v892_v3, 0.0 }
 0x3dd   : > { %895 = vrot.lane.b32.xlu1 %v2021_v4, %s2298_s21  ;;  %v927_v3 = vmul.f32 %v2021_v4, %v1927_v22 }
 0x3de   : > { %897 = vrot.lane.b32.xlu0 %v2023_v6, %s2298_s21  ;;  %s2322_s21 = sand.u32 1, %s1630_s10  }
 0x3e1   : > { %903 = vrot.lane.b32.xlu1 %v2021_v4, %s2314_s22 }
 0x3e2   : > { %905 = vrot.lane.b32.xlu0 %v2023_v6, %s2314_s22 }
 0x3e5   : > { %911 = vrot.lane.b32.xlu1 %v2021_v4, %s2315_s26 }
 0x3e6   : > { %913 = vrot.lane.b32.xlu0 %v2023_v6, %s2315_s26 }
 0x3e9   : > { %919 = vrot.lane.b32.xlu1 %v2021_v4, %s2316_s28 }
 0x3ea   : > { %921 = vrot.lane.b32.xlu0 %v2023_v6, %s2316_s28 }
 0x3ed   : > { %929 = vrot.lane.b32.xlu1 %v2021_v4, %s2317_s29 }
 0x3ee   : > { %931 = vrot.lane.b32.xlu0 %v2023_v6, %s2317_s29 }
 0x3f1   : > { %937 = vrot.lane.b32.xlu1 %v2021_v4, %s2318_s14 }
 0x3f2   : > { %939 = vrot.lane.b32.xlu0 %v2023_v6, %s2318_s14 }
 0x3f5   : > { %945 = vrot.lane.b32.xlu1 %v2021_v4, %s2319_s16 }
 0x3f6   : > { %947 = vrot.lane.b32.xlu0 %v2023_v6, %s2319_s16 }
 0x3f9   : > { %953 = vrot.lane.b32.xlu1 %v2021_v4, %s2320_s25 }
 0x3fa   : > { %955 = vrot.lane.b32.xlu0 %v2023_v6, %s2320_s25 }
 0x3fd   : > { %967 = vperm.xlu1 %1574, %v1443_v7  }
 0x3fe   : > { %1055 = vperm.xlu0 %1573, %v1445_v8  }
 0x401   : > { %1060 = vperm.xlu1 %1574, %v1446_v9   ;;  %v928_v9 = vmul.f32 %v2023_v6, %v1924_v21 }
 0x402   : > { %1072 = vperm.xlu0 %1573, %v1447_v10  }
 0x405   : > { %1077 = vperm.xlu1 %1574, %v1448_v16  }
 0x406   : > { %1168 = vperm.xlu0 %1573, %v1451_v53  }
 0x409   : > { %1177 = vperm.xlu1 %1574, %v1452_v17  }
 0x44f   : > { %v896_v18 = vpop.permute.xlu1 %895 }
 0x450   : > { %v898_v50 = vpop.permute.xlu0 %897 }
 0x451   : > { %v899_v19 = vsel %vm498_vm1, %v896_v18, %v898_v50  ;;  %v900_v20 = vsel %vm498_vm1, %v898_v50, %v896_v18 }
 0x452   : > { %v901_v29 = vmul.f32 %v900_v20, %v1868_v54  ;;  %v902_v30 = vmul.f32 %v899_v19, %v1875_v56 }
 0x453   : > { %v904_v23 = vpop.permute.xlu1 %903 }
 0x454   : > { %v906_v24 = vpop.permute.xlu0 %905 }
 0x455   : > { %v907_v27 = vsel %vm518_vm2, %v904_v23, %v906_v24  ;;  %v908_v28 = vsel %vm518_vm2, %v906_v24, %v904_v23 }
 0x456   : > { %v909_v31 = vmul.f32 %v908_v28, %v1872_v55  ;;  %v910_v32 = vmul.f32 %v907_v27, %v1878_v57 }
 0x457   : > { %v912_v33 = vpop.permute.xlu1 %911 }
 0x458   : > { %v1489_v38 = vpack.c.bf16 %v909_v31, %v901_v29  ;;  %v914_v39 = vpop.permute.xlu0 %913  ;;  %v1487_v40 = vpack.c.bf16 %v910_v32, %v902_v30 }
 0x459   : > { %v915_v41 = vsel %vm538_vm3, %v912_v33, %v914_v39  ;;  %v916_v42 = vsel %vm538_vm3, %v914_v39, %v912_v33 }
 0x45a   : > { %1488 = vmatprep.subr.bf16.mxu0 %v1487_v40  ;;  %v917_v48 = vmul.f32 %v916_v42, %v1900_v11  ;;  %v918_v49 = vmul.f32 %v915_v41, %v1906_v13  ;;  %v1442_v41 = vld [vmem:[%s2280_s7 + $0x4] sm:$0xf] }
 0x45b   : > { %v920_v43 = vpop.permute.xlu1 %919  ;;  %1490 = vmatpush1.bf16.msra.mxu0 %v1489_v38 }
 0x45c   : > { %v922_v44 = vpop.permute.xlu0 %921 }
 0x45d   : > { %v923_v45 = vsel %vm558_vm4, %v920_v43, %v922_v44  ;;  %v924_v46 = vsel %vm558_vm4, %v922_v44, %v920_v43 }
 0x45e   : > { %v925_v58 = vmul.f32 %v924_v46, %v1910_v14  ;;  %v926_v59 = vmul.f32 %v923_v45, %v1913_v15 }
 0x45f   : > { %v930_v60 = vpop.permute.xlu1 %929 }
 0x460   : > { %v1493_v61 = vpack.c.bf16 %v925_v58, %v917_v48  ;;  %v932_v62 = vpop.permute.xlu0 %931  ;;  %v1491_v63 = vpack.c.bf16 %v926_v59, %v918_v49 }
 0x461   : > { %v933_v0 = vsel %vm591_vm5, %v930_v60, %v932_v62  ;;  %v934_v2 = vsel %vm591_vm5, %v932_v62, %v930_v60 }
 0x462   : > { %v935_v7 = vmul.f32 %v933_v0, %v1934_v25  ;;  %v936_v8 = vmul.f32 %v934_v2, %v1937_v26  ;;  %1492 = vmatprep.subr.bf16.mxu0 %v1491_v63 }
 0x463   : > { %v938_v10 = vpop.permute.xlu1 %937  ;;  %1494 = vmatpush1.bf16.msra.mxu0 %v1493_v61 }
 0x464   : > { %v1497_v16 = vpack.c.bf16 %v935_v7, %v927_v3  ;;  %v940_v53 = vpop.permute.xlu0 %939  ;;  %v1495_v17 = vpack.c.bf16 %v936_v8, %v928_v9 }
 0x465   : > { %v941_v18 = vsel %vm611_vm6, %v938_v10, %v940_v53  ;;  %v942_v4 = vsel %vm611_vm6, %v940_v53, %v938_v10 }
 0x466   : > { %1496 = vmatprep.subr.bf16.mxu0 %v1495_v17  ;;  %v943_v23 = vmul.f32 %v941_v18, %v1961_v51  ;;  %v944_v24 = vmul.f32 %v942_v4, %v1964_v52 }
 0x467   : > { %v946_v50 = vpop.permute.xlu1 %945  ;;  %1498 = vmatpush1.bf16.msra.mxu0 %v1497_v16 }
 0x468   : > { %v948_v19 = vpop.permute.xlu0 %947 }
 0x469   : > { %v949_v20 = vsel %vm631_vm7, %v946_v50, %v948_v19  ;;  %v950_v6 = vsel %vm631_vm7, %v948_v19, %v946_v50 }
 0x46a   : > { %v951_v27 = vmul.f32 %v949_v20, %v1968_v36  ;;  %v952_v28 = vmul.f32 %v950_v6, %v1971_v37 }
 0x46b   : > { %v954_v29 = vpop.permute.xlu1 %953 }
 0x46c   : > { %v1501_v30 = vpack.c.bf16 %v951_v27, %v943_v23  ;;  %v956_v31 = vpop.permute.xlu0 %955  ;;  %v1499_v32 = vpack.c.bf16 %v952_v28, %v944_v24 }
 0x46d   : > { %v958_v33 = vsel %vm651_vm8, %v956_v31, %v954_v29  ;;  %v957_v38 = vsel %vm651_vm8, %v954_v29, %v956_v31  ;;  %v1454_v29 = vld [vmem:[%s2281_s8 + $0x8] sm:$0xf] }
 0x46e   : > { %v960_v39 = vmul.f32 %v958_v33, %v1986_v1  ;;  %1500 = vmatprep.subr.bf16.mxu0 %v1499_v32  ;;  %v959_v40 = vmul.f32 %v957_v38, %v1993_v12 }
 0x46f   : > { %1502 = vmatpush1.bf16.msra.mxu0 %v1501_v30 }
 0x470   : > { %989 = vmatprep.subr.mxu0 %v960_v39 }
 0x473   : > { %990 = vmatpush1.msra.mxu0 %v959_v40 }
 0x474   : > { %1444 = vmatmul.mubr.msk.f32.vlgmr.msra.gmra.mrb[4].mxu0 %vm674_vm9, %v1442_v41 }
 0x475   : > { %1157 = vmatprep.mubr.f32.mxu0 %v1641_v5 }
 0x47c   : > { %v968_v42 = vpop.permute.xlu1 %967 }
 0x47d   : > { %v1056_v48 = vpop.permute.xlu0 %1055 }
 0x47e   : > { %v1064_v59 = vmul.f32 %v1056_v48, %v2012_v35  ;;  %v1063_v61 = vmul.f32 %v1056_v48, %v2009_v34  ;;  %v1449_v34 = vld [vmem:[%s2277_s4 + $0x10] sm:$0xff] }
 0x480   : > { %v1061_v49 = vpop.permute.xlu1 %1060 }
 0x481   : > { %v1073_v58 = vpop.permute.xlu0 %1072 }
 0x482   : > { %v1081_v0 = vadd.f32 %v1073_v58, %v1064_v59  ;;  %v1080_v3 = vadd.f32 %v1073_v58, %v1063_v61 }
 0x484   : > { %v1078_v2 = vpop.permute.xlu1 %1077  ;;  %v1085_v10 = vmax.f32 %v1081_v0, 0.0  ;;  %v1084_v53 = vmax.f32 %v1080_v3, 0.0 }
 0x485   : > { %v1169_v35 = vpop.permute.xlu0 %1168 }
 0x488   : > { %v1178_v20 = vpop.permute.xlu1 %1177 }
 0x547   : > { %v1039_v43 = vpop.f32.mrb[4].mxu0 }
 0x548   : > { %v1040_v44 = vadd.f32 %v1039_v43, %v968_v42  ;;  %v1041_v45 = vpop.f32.mrb[5].mxu0 }
 0x549   : > { %v1042_v46 = vadd.f32 %v1041_v45, %v968_v42 }
 0x54a   : > { %1044 = vst [vmem:[%s1767_s17 + $0x10] sm:$0xf] %v1040_v44 }
 0x54b   : > { %1045 = vst [vmem:[%s1767_s17 + $0x18] sm:$0xf] %v1042_v46 }
 0x551   : > { %v1048_v60 = vld [vmem:[%s1767_s17 + $0x10] sm:$0xff] }
 0x552   : > { %v1049_v62 = vld [vmem:[%s1767_s17 + $0x18] sm:$0xff]  ;;  %v1065_v63 = vmul.f32 %v1061_v49, %v1048_v60 }
 0x553   : > { %v1066_v5 = vmul.f32 %v1061_v49, %v1049_v62 }
 0x554   : > { %v1082_v7 = vadd.f32 %v1078_v2, %v1065_v63 }
 0x555   : > { %v1083_v8 = vadd.f32 %v1078_v2, %v1066_v5 }
 0x556   : > { %v1086_v9 = vmax.f32 %v1082_v7, 0.0 }
 0x557   : > { %v1087_v16 = vmax.f32 %v1083_v8, 0.0 }
 0x558   : > { %v1505_v18 = vpack.c.bf16 %v1086_v9, %v1084_v53 }
 0x559   : > { %v1503_v17 = vpack.c.bf16 %v1087_v16, %v1085_v10 }
 0x55b   : > { %1504 = vmatprep.subr.bf16.mxu0 %v1503_v17 }
 0x55c   : > { %1506 = vmatpush1.bf16.msra.mxu0 %v1505_v18 }
 0x55f   : > { %1450 = vmatmul.mubr.msk.f32.vlgmr.msra.gmra.mrb[6].mxu0 %vm399_vm0, %v1449_v34 }
 0x632   : > { %v1159_v4 = vpop.f32.mrb[6].mxu0 }
 0x633   : > { %v1171_v50 = vmul.f32 %v1169_v35, %v1159_v4  ;;  %v1161_v19 = vpop.f32.mrb[7].mxu0 }
 0x634   : > { %v1172_v6 = vmul.f32 %v1169_v35, %v1161_v19 }
 0x635   : > { %v1180_v23 = vadd.f32 %v1178_v20, %v1171_v50 }
 0x636   : > { %v1181_v24 = vadd.f32 %v1178_v20, %v1172_v6 }
 0x637   : > { %v1182_v27 = vmax.f32 %v1180_v23, 0.0 }
 0x638   : > { %v1183_v28 = vmax.f32 %v1181_v24, 0.0 }
 0x639   : > { %1184 = vrot.lane.b32.xlu0 %v1182_v27, %s2321_s18  ;;  %v1216_v10 = vmul.f32 %v1182_v27, %v1927_v22 }
 0x63a   : > { %1186 = vrot.lane.b32.xlu1 %v1183_v28, %s2321_s18 }
 0x63d   : > { %1192 = vrot.lane.b32.xlu0 %v1182_v27, %s2314_s22 }
 0x63e   : > { %1194 = vrot.lane.b32.xlu1 %v1183_v28, %s2314_s22 }
 0x641   : > { %1200 = vrot.lane.b32.xlu0 %v1182_v27, %s2315_s26 }
 0x642   : > { %1202 = vrot.lane.b32.xlu1 %v1183_v28, %s2315_s26 }
 0x645   : > { %1208 = vrot.lane.b32.xlu0 %v1182_v27, %s2316_s28 }
 0x646   : > { %1210 = vrot.lane.b32.xlu1 %v1183_v28, %s2316_s28 }
 0x649   : > { %1218 = vrot.lane.b32.xlu0 %v1182_v27, %s2317_s29 }
 0x64a   : > { %1220 = vrot.lane.b32.xlu1 %v1183_v28, %s2317_s29 }
 0x64d   : > { %1226 = vrot.lane.b32.xlu0 %v1182_v27, %s2318_s14 }
 0x64e   : > { %1228 = vrot.lane.b32.xlu1 %v1183_v28, %s2318_s14  ;;  %s1462_s14 = sshll.u32 %s1723_s13, 9  ;;  %s2231_s13 = scalar_lea.sflag [#allocation3], %s2322_s21 }
 0x64f   : > { %s2223_s23 = scalar_lea.hbm %s2282_s9, %s1462_s14 }
 0x651   : > { %1234 = vrot.lane.b32.xlu0 %v1182_v27, %s2319_s16 }
 0x652   : > { %1236 = vrot.lane.b32.xlu1 %v1183_v28, %s2319_s16  ;;  %s1355_s16 = sshll.u32 %s1767_s17, 4  ;;  %s2225_s16 = int_to_ptr.vmem [resolvable:$true] %s1355_s16 }
 0x653   : > { %s1576_s24 = scalar_lea.vmem %s2225_s16, 512  ;;  %p1583_p0 = scmp.lt.s32.totalorder %s2225_s16, %s1581_s1 }
 0x654   : > { %p1577_p11 = scmp.ne.s32.totalorder %s2225_s16, %s1576_s24  ;;  %p1584_p1 = scmp.lt.s32.totalorder %s1582_s11, %s1576_s24 }
 0x655   : > { %1242 = vrot.lane.b32.xlu0 %v1182_v27, %s2320_s25 }
 0x656   : > { %1244 = vrot.lane.b32.xlu1 %v1183_v28, %s2320_s25  ;;  %p1578_p12 = pnand %p1577_p11, %p1740_p5  ;;  %p1585_p2 = por %p1584_p1, %p1583_p0 }
 0x658   : > { %p1579_p13 = pneg %p1578_p12 }
 0x659   : > { %1256 = vperm.xlu0 %1573, %v1454_v29  }
 0x65a   : > { %p1586_p3 = pnand %p1585_p2, %p1579_p13 }
 0x6ab   : > { %v1185_v30 = vpop.permute.xlu0 %1184 }
 0x6ac   : > { %v1187_v31 = vpop.permute.xlu1 %1186 }
 0x6ad   : > { %v1188_v32 = vsel %vm498_vm1, %v1185_v30, %v1187_v31  ;;  %v1189_v33 = vsel %vm498_vm1, %v1187_v31, %v1185_v30 }
 0x6ae   : > { %v1190_v42 = vmul.f32 %v1189_v33, %v1868_v54  ;;  %v1191_v43 = vmul.f32 %v1188_v32, %v1875_v56 }
 0x6af   : > { %v1193_v38 = vpop.permute.xlu0 %1192 }
 0x6b0   : > { %v1195_v39 = vpop.permute.xlu1 %1194 }
 0x6b1   : > { %v1196_v40 = vsel %vm518_vm2, %v1193_v38, %v1195_v39  ;;  %v1197_v41 = vsel %vm518_vm2, %v1195_v39, %v1193_v38 }
 0x6b2   : > { %v1198_v44 = vmul.f32 %v1197_v41, %v1872_v55  ;;  %v1199_v45 = vmul.f32 %v1196_v40, %v1878_v57 }
 0x6b3   : > { %v1201_v46 = vpop.permute.xlu0 %1200 }
 0x6b4   : > { %v1509_v48 = vpack.c.bf16 %v1198_v44, %v1190_v42  ;;  %v1203_v49 = vpop.permute.xlu1 %1202  ;;  %v1507_v58 = vpack.c.bf16 %v1199_v45, %v1191_v43 }
 0x6b5   : > { %v1204_v59 = vsel %vm538_vm3, %v1201_v46, %v1203_v49  ;;  %v1205_v60 = vsel %vm538_vm3, %v1203_v49, %v1201_v46 }
 0x6b6   : > { %1508 = vmatprep.subr.bf16.mxu1 %v1507_v58  ;;  %v1206_v57 = vmul.f32 %v1205_v60, %v1900_v11  ;;  %v1207_v62 = vmul.f32 %v1204_v59, %v1906_v13 }
 0x6b7   : > { %v1209_v61 = vpop.permute.xlu0 %1208  ;;  %1510 = vmatpush1.bf16.msra.mxu1 %v1509_v48 }
 0x6b8   : > { %v1211_v54 = vpop.permute.xlu1 %1210 }
 0x6b9   : > { %v1212_v56 = vsel %vm558_vm4, %v1209_v61, %v1211_v54  ;;  %v1213_v55 = vsel %vm558_vm4, %v1211_v54, %v1209_v61 }
 0x6ba   : > { %v1214_v63 = vmul.f32 %v1213_v55, %v1910_v14  ;;  %v1215_v0 = vmul.f32 %v1212_v56, %v1913_v15  ;;  %v1217_v14 = vmul.f32 %v1183_v28, %v1924_v21 }
 0x6bb   : > { %v1219_v2 = vpop.permute.xlu0 %1218 }
 0x6bc   : > { %v1513_v5 = vpack.c.bf16 %v1214_v63, %v1206_v57  ;;  %v1221_v3 = vpop.permute.xlu1 %1220  ;;  %v1511_v7 = vpack.c.bf16 %v1215_v0, %v1207_v62 }
 0x6bd   : > { %v1222_v8 = vsel %vm591_vm5, %v1219_v2, %v1221_v3  ;;  %v1223_v9 = vsel %vm591_vm5, %v1221_v3, %v1219_v2 }
 0x6be   : > { %v1224_v11 = vmul.f32 %v1222_v8, %v1934_v25  ;;  %v1225_v13 = vmul.f32 %v1223_v9, %v1937_v26  ;;  %1512 = vmatprep.subr.bf16.mxu1 %v1511_v7 }
 0x6bf   : > { %v1227_v15 = vpop.permute.xlu0 %1226  ;;  %1514 = vmatpush1.bf16.msra.mxu1 %v1513_v5 }
 0x6c0   : > { %v1517_v16 = vpack.c.bf16 %v1224_v11, %v1216_v10  ;;  %v1229_v53 = vpop.permute.xlu1 %1228  ;;  %v1515_v17 = vpack.c.bf16 %v1225_v13, %v1217_v14 }
 0x6c1   : > { %v1230_v18 = vsel %vm611_vm6, %v1227_v15, %v1229_v53  ;;  %v1231_v34 = vsel %vm611_vm6, %v1229_v53, %v1227_v15 }
 0x6c2   : > { %1516 = vmatprep.subr.bf16.mxu1 %v1515_v17  ;;  %v1232_v35 = vmul.f32 %v1230_v18, %v1961_v51  ;;  %v1233_v4 = vmul.f32 %v1231_v34, %v1964_v52 }
 0x6c3   : > { %v1235_v22 = vpop.permute.xlu0 %1234  ;;  %1518 = vmatpush1.bf16.msra.mxu1 %v1517_v16 }
 0x6c4   : > { %v1237_v25 = vpop.permute.xlu1 %1236 }
 0x6c5   : > { %v1238_v26 = vsel %vm631_vm7, %v1235_v22, %v1237_v25  ;;  %v1239_v21 = vsel %vm631_vm7, %v1237_v25, %v1235_v22 }
 0x6c6   : > { %v1240_v50 = vmul.f32 %v1238_v26, %v1968_v36  ;;  %v1241_v19 = vmul.f32 %v1239_v21, %v1971_v37  ;;  %v1453_v36 = vld [vmem:[%s2280_s7 + $0x8] sm:$0xf] }
 0x6c7   : > { %v1243_v20 = vpop.permute.xlu0 %1242 }
 0x6c8   : > { %v1521_v6 = vpack.c.bf16 %v1240_v50, %v1232_v35  ;;  %v1245_v23 = vpop.permute.xlu1 %1244  ;;  %v1519_v24 = vpack.c.bf16 %v1241_v19, %v1233_v4 }
 0x6c9   : > { %v1247_v27 = vsel %vm651_vm8, %v1245_v23, %v1243_v20  ;;  %v1246_v28 = vsel %vm651_vm8, %v1243_v20, %v1245_v23 }
 0x6ca   : > { %v1249_v51 = vmul.f32 %v1247_v27, %v1986_v1  ;;  %1520 = vmatprep.subr.bf16.mxu1 %v1519_v24  ;;  %v1248_v52 = vmul.f32 %v1246_v28, %v1993_v12 }
 0x6cb   : > { %1522 = vmatpush1.bf16.msra.mxu1 %v1521_v6 }
 0x6cc   : > { %1278 = vmatprep.subr.mxu1 %v1249_v51 }
 0x6cf   : > { %1279 = vmatpush1.msra.mxu1 %v1248_v52 }
 0x6d0   : > { %1455 = vmatmul.mubr.msk.f32.vlgmr.msra.gmra.mrb[2].mxu1 %vm674_vm9, %v1453_v36 }
 0x6d8   : > { %v1257_v37 = vpop.permute.xlu0 %1256 }
 0x7a3   : > { %v1328_v47 = vpop.f32.mrb[2].mxu1 }
 0x7a4   : > { %v1329_v1 = vadd.f32 %v1328_v47, %v1257_v37  ;;  %v1330_v29 = vpop.f32.mrb[3].mxu1 }
 0x7a5   : > { %v1331_v30 = vadd.f32 %v1330_v29, %v1257_v37 }
 0x7a6   : > { %v1335_v31 = vrot.slane %v1329_v1, 4 }
 0x7a7   : > { %v1336_v12 = vrot.slane %v1331_v30, 4 }
 0x7a8   : > { %1339 = vst [vmem:[%s1767_s17 + $0x10] sm:$0xf0] %v1335_v31 }
 0x7a9   : > { %1340 = vst [vmem:[%s1767_s17 + $0x18] sm:$0xf0] %v1336_v12 }
 0x7aa   : > { %1589 = shalt.err (!%p1586_p3)
}
 0x7ab   : > { %s1590_s17 = scalar_lea.hbm %s2223_s23, 512  ;;  %s1594_s20 = scalar_lea.hbm %s2282_s9, 1024 }
 0x7ac   : > { %p1591_p4 = scmp.ne.s32.totalorder %s2223_s23, %s1590_s17  ;;  %p1595_p9 = scmp.lt.u32.totalorder %s2223_s23, %s2282_s9 }
 0x7ad   : > { %p1596_p10 = scmp.lt.u32.totalorder %s1594_s20, %s1590_s17  ;;  %p1598_p12 = scmp.lt.u32.totalorder %s1590_s17, %s2223_s23 }
 0x7ae   : > { %p1592_p7 = pnand %p1591_p4, %p1740_p5 }
 0x7af   : > { %p1597_p11 = por %p1596_p10, %p1595_p9 }
 0x7b0   : > { %p1593_p8 = pneg %p1592_p7 }
 0x7b1   : > { %p1599_p13 = por %p1598_p12, %p1597_p11 }
 0x7b3   : > { %p1600_p0 = pnand %p1599_p13, %p1593_p8 }
 0x7b5   : > { %1603 = shalt.err (!%p1600_p0)
}
 0x7b6   : > { %s1651_s29 = smov 256  }
 0x7b7   : > { %1523 = dma.vmem_to_hbm [thread:$0]  (%p1740_p5), %s2225_s16, 512, %s2223_s23, %s2231_s13, %s1651_s29, %s1651_s29, %s2314_s22  }
 0x7b8 PF: > { %p1529_p1 = scmp.ge.s32.totalorder %s1638_s12, 2  ;;  %s1370_s25 = sand.u32 1, %s1626_s30  }
 0x7b9   : > { %s1371_s27 = scalar_lea.sflag [#allocation3], %s1370_s25 }
 0x7ba   : > { %p1526_p2 = pnand %p1529_p1, %p1744_p6 }
 0x7bc   : > { %1621 = dma.done.wait (!%p1526_p2), %s1371_s27, 512  }
 0x7bd   : > { %1623 = vsyncadd (!%p1526_p2), %s1371_s27, 4294966784  ;;  %s2324_s12 = sld [smem:[#allocation6_spill]]  ;;  %s2325_s21 = sld [smem:[#allocation5_spill]] }
 0x7be   : > { %s2326_s11 = sld [smem:[#allocation7_spill]]  ;;  %s2327_s30 = smov %s1630_s10 }
 0x7c3   : > { %p19_p3 = scmp.ge.s32.totalorder %s2324_s12, 4   ;;  %s2328_s10 = smov %s2325_s21 }
 0x7c5   :  { %21 = sbr.rel (!%p19_p3) target bundleno = 6 (0x6), region = 113 }
 0x7cc   :  { %1376 = vsyncpa [#allocation3], 1 }
 0x7cd   :  { %1378 = vsyncpa [#allocation3 + $0x1], 1 }

</bundles_post_ra>
